<compile_context>
chip_gen: v7x
topology: tpu7x:2x2x1
jax: 0.10.0
libtpu: 0.0.40
codegen_flags: <defaults>
</compile_context>

<pallas_src>
import functools
import math

import jax
import jax.numpy as jnp
from jax import lax
from jax.experimental import pallas as pl
from jax.experimental.pallas import tpu as pltpu

LANE = 128  # lane tile width: tiny head dims are zero-padded up to this


# ---------------------------------------------------------------------------
# Kernel 1: 3x3 conv (stride 1, pad 1) + bias + ReLU, NHWC, in-kernel 9-tap
# accumulation. One grid step == one sample; output rows are NHWC-flattened.
# ---------------------------------------------------------------------------
def _conv3x3_kernel(x_ref, w_ref, b_ref, o_ref, *, H, W, C, Cf):
    # x_ref: (1, H+2, W+2, C) f32   padded NHWC sample (one DMA per step)
    # w_ref: (9, C, Cf)       f32   tap-major: w[kh*3+kw, c, f]
    # b_ref: (1, Cf)          f32
    # o_ref: (H*W, Cf)        bf16  row = h*W + w  (NHWC flatten order)
    acc = jnp.zeros((H * W, Cf), jnp.float32)
    for kh in range(3):                      # static unrolled taps
        for kw in range(3):
            xs = x_ref[:, kh:kh + H, kw:kw + W, :]     # (1, H, W, C)
            # W % 8 == 0 -> layout-preserving collapse of leading dims
            xs2 = xs.reshape(H * W, C)
            acc = acc + jnp.dot(xs2, w_ref[kh * 3 + kw],
                                preferred_element_type=jnp.float32)
    acc = jnp.maximum(acc + b_ref[...], 0.0)
    o_ref[...] = acc.astype(o_ref.dtype)


def conv3x3_relu_features(x_nchw, w_taps, b_row, *, out_dtype=jnp.bfloat16):
    """Conv stem; returns NHWC-flattened features of shape (N, H*W*Cf)."""
    x_nchw = x_nchw.astype(jnp.float32)
    N, C, H, W = x_nchw.shape
    Cf = w_taps.shape[-1]
    # TODO(synk): in-kernel flatten assumes W % 8 == 0 (true for typical sizes).
    assert W % 8 == 0, "width must be sublane-aligned for the in-kernel flatten"

    x_nhwc = jnp.transpose(x_nchw, (0, 2, 3, 1))            # one-off, tiny input
    xp = jnp.pad(x_nhwc, ((0, 0), (1, 1), (1, 1), (0, 0)))  # SAME padding
    Hp, Wp = H + 2, W + 2

    kern = functools.partial(_conv3x3_kernel, H=H, W=W, C=C, Cf=Cf)
    flops = 2 * N * H * W * C * Cf * 9
    bytes_acc = xp.size * 4 + w_taps.size * 4 + b_row.size * 4 + N * H * W * Cf * 2

    feats = pl.pallas_call(
        kern,
        out_shape=jax.ShapeDtypeStruct((N * H * W, Cf), out_dtype),
        grid_spec=pltpu.PrefetchScalarGridSpec(
            num_scalar_prefetch=0,
            grid=(N,),
            in_specs=[
                pl.BlockSpec((1, Hp, Wp, C), lambda n: (n, 0, 0, 0)),
                pl.BlockSpec((9, C, Cf), lambda n: (0, 0, 0)),
                pl.BlockSpec((1, Cf), lambda n: (0, 0)),
            ],
            out_specs=pl.BlockSpec((H * W, Cf), lambda n: (n, 0)),
        ),
        compiler_params=pltpu.CompilerParams(dimension_semantics=("parallel",)),
        cost_estimate=pl.CostEstimate(flops=flops, transcendentals=0,
                                      bytes_accessed=bytes_acc),
    )(xp, w_taps, b_row)
    # Free contiguous reshape: (N*H*W, Cf) -> (N, H*W*Cf)  (NHWC flatten).
    return feats.reshape(N, H * W * Cf)


# ---------------------------------------------------------------------------
# Kernel 2: fused MLP — concept projection (2 layers) + classification head
# (2 layers). All intermediates stay in VMEM; tiny dims padded to 128 lanes.
# ---------------------------------------------------------------------------
def _mlp_kernel(x_ref, w1_ref, b1_ref, w2_ref, b2_ref, w3_ref, b3_ref,
                w4_ref, b4_ref, logits_ref, concepts_ref):
    x = x_ref[...]                                                   # (TB, F) bf16
    h = jnp.dot(x, w1_ref[...], preferred_element_type=jnp.float32)
    h = jnp.maximum(h + b1_ref[...], 0.0)                            # (TB, 128)
    c = jnp.dot(h.astype(jnp.bfloat16), w2_ref[...],
                preferred_element_type=jnp.float32) + b2_ref[...]    # padded concepts
    concepts_ref[...] = c.astype(concepts_ref.dtype)
    h2 = jnp.dot(c.astype(jnp.bfloat16), w3_ref[...],
                 preferred_element_type=jnp.float32)
    h2 = jnp.maximum(h2 + b3_ref[...], 0.0)
    out = jnp.dot(h2.astype(jnp.bfloat16), w4_ref[...],
                  preferred_element_type=jnp.float32) + b4_ref[...]
    logits_ref[...] = out.astype(logits_ref.dtype)


def mlp_heads(flat_bf, kp):
    """Returns (logits_padded, concepts_padded), each (N, 128) f32."""
    N, F = flat_bf.shape
    TB = N if N <= 128 else 128            # 128-row tiles once batch grows
    pad_n = (-N) % TB
    if pad_n:
        flat_bf = jnp.pad(flat_bf, ((0, pad_n), (0, 0)))
    NP = flat_bf.shape[0]

    flops = 2 * NP * (F * LANE + 3 * LANE * LANE)
    bytes_acc = (flat_bf.size * 2 + kp["w1"].size * 2 + 3 * LANE * LANE * 2
                 + 4 * LANE * 4 + 2 * NP * LANE * 4)

    logits_p, concepts_p = pl.pallas_call(
        _mlp_kernel,
        out_shape=(jax.ShapeDtypeStruct((NP, LANE), jnp.float32),
                   jax.ShapeDtypeStruct((NP, LANE), jnp.float32)),
        grid_spec=pltpu.PrefetchScalarGridSpec(
            num_scalar_prefetch=0,
            grid=(NP // TB,),
            in_specs=[
                pl.BlockSpec((TB, F), lambda i: (i, 0)),
                pl.BlockSpec((F, LANE), lambda i: (0, 0)),
                pl.BlockSpec((1, LANE), lambda i: (0, 0)),
                pl.BlockSpec((LANE, LANE), lambda i: (0, 0)),
                pl.BlockSpec((1, LANE), lambda i: (0, 0)),
                pl.BlockSpec((LANE, LANE), lambda i: (0, 0)),
                pl.BlockSpec((1, LANE), lambda i: (0, 0)),
                pl.BlockSpec((LANE, LANE), lambda i: (0, 0)),
                pl.BlockSpec((1, LANE), lambda i: (0, 0)),
            ],
            out_specs=[pl.BlockSpec((TB, LANE), lambda i: (i, 0)),
                       pl.BlockSpec((TB, LANE), lambda i: (i, 0))],
        ),
        compiler_params=pltpu.CompilerParams(dimension_semantics=("parallel",)),
        cost_estimate=pl.CostEstimate(flops=flops, transcendentals=0,
                                      bytes_accessed=bytes_acc),
    )(flat_bf, kp["w1"], kp["b1"], kp["w2"], kp["b2"],
      kp["w3"], kp["b3"], kp["w4"], kp["b4"])
    return logits_p[:N], concepts_p[:N]


# ---------------------------------------------------------------------------
# Parameters: PyTorch-style init + one-off packing for the kernels
# ---------------------------------------------------------------------------
def _uniform(key, shape, fan_in):
    bound = 1.0 / math.sqrt(float(fan_in))
    return jax.random.uniform(key, shape, jnp.float32, -bound, bound)


def init_cbm_params(key, input_shape, num_concepts, num_classes,
                    feat_channels=8, concept_hidden=128, cls_hidden=8):
    C, H, W = input_shape
    output_units = num_classes if num_classes > 2 else 1
    in_features = feat_channels * H * W
    ks = jax.random.split(key, 10)
    return {
        "conv_w": _uniform(ks[0], (feat_channels, C, 3, 3), C * 9),
        "conv_b": _uniform(ks[1], (feat_channels,), C * 9),
        "cp_w1": _uniform(ks[2], (in_features, concept_hidden), in_features),
        "cp_b1": _uniform(ks[3], (concept_hidden,), in_features),
        "cp_w2": _uniform(ks[4], (concept_hidden, num_concepts), concept_hidden),
        "cp_b2": _uniform(ks[5], (num_concepts,), concept_hidden),
        "ch_w1": _uniform(ks[6], (num_concepts, cls_hidden), num_concepts),
        "ch_b1": _uniform(ks[7], (cls_hidden,), num_concepts),
        "ch_w2": _uniform(ks[8], (cls_hidden, output_units), cls_hidden),
        "ch_b2": _uniform(ks[9], (output_units,), cls_hidden),
    }


def pack_cbm_params(params, input_shape):
    """One-off init-time packing: fold NCHW->NHWC flatten permutation into
    cp_w1, zero-pad tiny head dims to 128 lanes, cast matmul weights to bf16."""
    C, H, W = input_shape
    Cf = params["conv_w"].shape[0]
    hid = params["cp_w1"].shape[1]
    assert hid == LANE, "concept_hidden is assumed lane-aligned (=128)"
    nc = params["cp_w2"].shape[1]
    ch = params["ch_w1"].shape[1]
    ou = params["ch_w2"].shape[1]

    def pad_to(a, rows, cols):
        return jnp.pad(a, ((0, rows - a.shape[0]), (0, cols - a.shape[1])))

    # conv weights as (tap, Cin, Cout): w_taps[kh*3+kw, c, f] = conv_w[f, c, kh, kw]
    w_taps = jnp.transpose(params["conv_w"], (2, 3, 1, 0)).reshape(9, C, Cf)
    b_row = params["conv_b"].reshape(1, Cf)

    # cp_w1 rows permuted from NCHW-flatten order to NHWC-flatten order
    w1 = (params["cp_w1"].reshape(Cf, H, W, hid)
          .transpose(1, 2, 0, 3).reshape(H * W * Cf, hid))

    return {
        "w_taps": w_taps,
        "b_row": b_row,
        "w1": w1.astype(jnp.bfloat16),
        "b1": params["cp_b1"].reshape(1, hid).astype(jnp.float32),
        "w2": pad_to(params["cp_w2"], hid, LANE).astype(jnp.bfloat16),
        "b2": pad_to(params["cp_b2"].reshape(1, nc), 1, LANE),
        "w3": pad_to(params["ch_w1"], LANE, LANE).astype(jnp.bfloat16),
        "b3": pad_to(params["ch_b1"].reshape(1, ch), 1, LANE),
        "w4": pad_to(params["ch_w2"], LANE, LANE).astype(jnp.bfloat16),
        "b4": pad_to(params["ch_b2"].reshape(1, ou), 1, LANE),
    }


# ---------------------------------------------------------------------------
# CBModel.forward: returns (class_logits, concept_preds)
# ---------------------------------------------------------------------------
def cbm_forward(packed, x_nchw, *, num_concepts, output_units):
    flat_bf = conv3x3_relu_features(x_nchw, packed["w_taps"], packed["b_row"])
    logits_p, concepts_p = mlp_heads(flat_bf, packed)
    return logits_p[:, :output_units], concepts_p[:, :num_concepts]


# ---------------------------------------------------------------------------
# Pure-JAX reference (same bf16-weight / f32-accumulate numerics)
# ---------------------------------------------------------------------------
def cbm_forward_ref(params, x_nchw):
    bf, f32 = jnp.bfloat16, jnp.float32
    N = x_nchw.shape[0]
    out = lax.conv_general_dilated(
        x_nchw, params["conv_w"], window_strides=(1, 1), padding="SAME",
        dimension_numbers=("NCHW", "OIHW", "NCHW"))
    out = jnp.maximum(out + params["conv_b"][None, :, None, None], 0.0)
    flat = out.reshape(N, -1)                      # NCHW flatten (torch order)
    h = jnp.maximum(jnp.dot(flat.astype(bf), params["cp_w1"].astype(bf),
                            preferred_element_type=f32) + params["cp_b1"], 0.0)
    concepts = jnp.dot(h.astype(bf), params["cp_w2"].astype(bf),
                       preferred_element_type=f32) + params["cp_b2"]
    h2 = jnp.maximum(jnp.dot(concepts.astype(bf), params["ch_w1"].astype(bf),
                             preferred_element_type=f32) + params["ch_b1"], 0.0)
    logits = jnp.dot(h2.astype(bf), params["ch_w2"].astype(bf),
                     preferred_element_type=f32) + params["ch_b2"]
    return logits, concepts


if __name__ == "__main__":
    key = jax.random.PRNGKey(0)
    k_param, k_x = jax.random.split(key)

    input_shape = (3, 16, 16)          # (C, H, W)
    num_concepts = 16
    num_classes = 5                    # > 2  ->  output_units = 5
    output_units = num_classes if num_classes > 2 else 1
    batch = 2

    params = init_cbm_params(k_param, input_shape, num_concepts, num_classes)
    packed = pack_cbm_params(params, input_shape)
    x = jax.random.normal(k_x, (batch,) + input_shape, jnp.float32)

    fwd = jax.jit(functools.partial(cbm_forward, num_concepts=num_concepts,
                                    output_units=output_units))
    logits, concepts = jax.block_until_ready(fwd(packed, x))

    ref_logits, ref_concepts = cbm_forward_ref(params, x)
    assert logits.shape == (batch, num_classes)
    assert concepts.shape == (batch, num_concepts)
    # bf16 matmul path -> relaxed tolerance vs. the reference.
    assert jnp.allclose(concepts, ref_concepts, atol=2e-2, rtol=2e-2), \
        float(jnp.max(jnp.abs(concepts - ref_concepts)))
    assert jnp.allclose(logits, ref_logits, atol=2e-2, rtol=2e-2), \
        float(jnp.max(jnp.abs(logits - ref_logits)))

    print("KERNEL_OK")
</pallas_src>

<mosaic_0001>
module attributes {stable_mosaic.version = 11 : i64} {
  func.func @_conv3x3_kernel(%arg0: i32, %arg1: memref<1x18x18x3xf32, #tpu.memory_space<vmem>>, %arg2: memref<9x3x8xf32, #tpu.memory_space<vmem>>, %arg3: memref<1x8xf32, #tpu.memory_space<vmem>>, %arg4: memref<256x8xbf16, #tpu.memory_space<vmem>>) attributes {dimension_semantics = [#tpu.dimension_semantics<parallel>], iteration_bounds = array<i64: 2>, scalar_prefetch = 0 : i64, scratch_operands = 0 : i64, tpu.core_type = #tpu.core_type<tc>, window_params = [{transform_indices = @transform_0, window_bounds = array<i64: 1, 18, 18, 3>}, {pipeline_mode = #tpu.pipeline_mode<synchronous>, transform_indices = @transform_1, window_bounds = array<i64: 9, 3, 8>}, {pipeline_mode = #tpu.pipeline_mode<synchronous>, transform_indices = @transform_2, window_bounds = array<i64: 1, 8>}, {transform_indices = @transform_3, window_bounds = array<i64: 256, 8>}]} {
    %cst = arith.constant 0.000000e+00 : f32
    %0 = vector.broadcast %cst : f32 to vector<256x8xf32>
    %c0 = arith.constant 0 : index
    %c0_0 = arith.constant 0 : index
    %c0_1 = arith.constant 0 : index
    %c0_2 = arith.constant 0 : index
    %1 = vector.load %arg1[%c0, %c0_0, %c0_1, %c0_2] : memref<1x18x18x3xf32, #tpu.memory_space<vmem>>, vector<1x16x16x3xf32>
    %2 = vector.shape_cast %1 : vector<1x16x16x3xf32> to vector<256x3xf32>
    %c0_3 = arith.constant 0 : index
    %c0_4 = arith.constant 0 : index
    %c0_5 = arith.constant 0 : index
    %3 = vector.load %arg2[%c0_3, %c0_4, %c0_5] : memref<9x3x8xf32, #tpu.memory_space<vmem>>, vector<1x3x8xf32>
    %4 = vector.shape_cast %3 : vector<1x3x8xf32> to vector<3x8xf32>
    %cst_6 = arith.constant dense<0.000000e+00> : vector<256x8xf32>
    %5 = tpu.matmul %2, %4, %cst_6 {dimension_numbers = #tpu.dot_dimension_numbers<[1], [0], [0], [1], [0, 0, 1, 1], [], []>} : vector<256x3xf32>, vector<3x8xf32>, vector<256x8xf32> -> vector<256x8xf32>
    %6 = arith.addf %0, %5 : vector<256x8xf32>
    %c0_7 = arith.constant 0 : index
    %c0_8 = arith.constant 0 : index
    %c1 = arith.constant 1 : index
    %c0_9 = arith.constant 0 : index
    %7 = vector.load %arg1[%c0_7, %c0_8, %c1, %c0_9] : memref<1x18x18x3xf32, #tpu.memory_space<vmem>>, vector<1x16x16x3xf32>
    %8 = vector.shape_cast %7 : vector<1x16x16x3xf32> to vector<256x3xf32>
    %c1_10 = arith.constant 1 : index
    %c0_11 = arith.constant 0 : index
    %c0_12 = arith.constant 0 : index
    %9 = vector.load %arg2[%c1_10, %c0_11, %c0_12] : memref<9x3x8xf32, #tpu.memory_space<vmem>>, vector<1x3x8xf32>
    %10 = vector.shape_cast %9 : vector<1x3x8xf32> to vector<3x8xf32>
    %cst_13 = arith.constant dense<0.000000e+00> : vector<256x8xf32>
    %11 = tpu.matmul %8, %10, %cst_13 {dimension_numbers = #tpu.dot_dimension_numbers<[1], [0], [0], [1], [0, 0, 1, 1], [], []>} : vector<256x3xf32>, vector<3x8xf32>, vector<256x8xf32> -> vector<256x8xf32>
    %12 = arith.addf %6, %11 : vector<256x8xf32>
    %c0_14 = arith.constant 0 : index
    %c0_15 = arith.constant 0 : index
    %c2 = arith.constant 2 : index
    %c0_16 = arith.constant 0 : index
    %13 = vector.load %arg1[%c0_14, %c0_15, %c2, %c0_16] : memref<1x18x18x3xf32, #tpu.memory_space<vmem>>, vector<1x16x16x3xf32>
    %14 = vector.shape_cast %13 : vector<1x16x16x3xf32> to vector<256x3xf32>
    %c2_17 = arith.constant 2 : index
    %c0_18 = arith.constant 0 : index
    %c0_19 = arith.constant 0 : index
    %15 = vector.load %arg2[%c2_17, %c0_18, %c0_19] : memref<9x3x8xf32, #tpu.memory_space<vmem>>, vector<1x3x8xf32>
    %16 = vector.shape_cast %15 : vector<1x3x8xf32> to vector<3x8xf32>
    %cst_20 = arith.constant dense<0.000000e+00> : vector<256x8xf32>
    %17 = tpu.matmul %14, %16, %cst_20 {dimension_numbers = #tpu.dot_dimension_numbers<[1], [0], [0], [1], [0, 0, 1, 1], [], []>} : vector<256x3xf32>, vector<3x8xf32>, vector<256x8xf32> -> vector<256x8xf32>
    %18 = arith.addf %12, %17 : vector<256x8xf32>
    %c0_21 = arith.constant 0 : index
    %c1_22 = arith.constant 1 : index
    %c0_23 = arith.constant 0 : index
    %c0_24 = arith.constant 0 : index
    %19 = vector.load %arg1[%c0_21, %c1_22, %c0_23, %c0_24] : memref<1x18x18x3xf32, #tpu.memory_space<vmem>>, vector<1x16x16x3xf32>
    %20 = vector.shape_cast %19 : vector<1x16x16x3xf32> to vector<256x3xf32>
    %c3 = arith.constant 3 : index
    %c0_25 = arith.constant 0 : index
    %c0_26 = arith.constant 0 : index
    %21 = vector.load %arg2[%c3, %c0_25, %c0_26] : memref<9x3x8xf32, #tpu.memory_space<vmem>>, vector<1x3x8xf32>
    %22 = vector.shape_cast %21 : vector<1x3x8xf32> to vector<3x8xf32>
    %cst_27 = arith.constant dense<0.000000e+00> : vector<256x8xf32>
    %23 = tpu.matmul %20, %22, %cst_27 {dimension_numbers = #tpu.dot_dimension_numbers<[1], [0], [0], [1], [0, 0, 1, 1], [], []>} : vector<256x3xf32>, vector<3x8xf32>, vector<256x8xf32> -> vector<256x8xf32>
    %24 = arith.addf %18, %23 : vector<256x8xf32>
    %c0_28 = arith.constant 0 : index
    %c1_29 = arith.constant 1 : index
    %c1_30 = arith.constant 1 : index
    %c0_31 = arith.constant 0 : index
    %25 = vector.load %arg1[%c0_28, %c1_29, %c1_30, %c0_31] : memref<1x18x18x3xf32, #tpu.memory_space<vmem>>, vector<1x16x16x3xf32>
    %26 = vector.shape_cast %25 : vector<1x16x16x3xf32> to vector<256x3xf32>
    %c4 = arith.constant 4 : index
    %c0_32 = arith.constant 0 : index
    %c0_33 = arith.constant 0 : index
    %27 = vector.load %arg2[%c4, %c0_32, %c0_33] : memref<9x3x8xf32, #tpu.memory_space<vmem>>, vector<1x3x8xf32>
    %28 = vector.shape_cast %27 : vector<1x3x8xf32> to vector<3x8xf32>
    %cst_34 = arith.constant dense<0.000000e+00> : vector<256x8xf32>
    %29 = tpu.matmul %26, %28, %cst_34 {dimension_numbers = #tpu.dot_dimension_numbers<[1], [0], [0], [1], [0, 0, 1, 1], [], []>} : vector<256x3xf32>, vector<3x8xf32>, vector<256x8xf32> -> vector<256x8xf32>
    %30 = arith.addf %24, %29 : vector<256x8xf32>
    %c0_35 = arith.constant 0 : index
    %c1_36 = arith.constant 1 : index
    %c2_37 = arith.constant 2 : index
    %c0_38 = arith.constant 0 : index
    %31 = vector.load %arg1[%c0_35, %c1_36, %c2_37, %c0_38] : memref<1x18x18x3xf32, #tpu.memory_space<vmem>>, vector<1x16x16x3xf32>
    %32 = vector.shape_cast %31 : vector<1x16x16x3xf32> to vector<256x3xf32>
    %c5 = arith.constant 5 : index
    %c0_39 = arith.constant 0 : index
    %c0_40 = arith.constant 0 : index
    %33 = vector.load %arg2[%c5, %c0_39, %c0_40] : memref<9x3x8xf32, #tpu.memory_space<vmem>>, vector<1x3x8xf32>
    %34 = vector.shape_cast %33 : vector<1x3x8xf32> to vector<3x8xf32>
    %cst_41 = arith.constant dense<0.000000e+00> : vector<256x8xf32>
    %35 = tpu.matmul %32, %34, %cst_41 {dimension_numbers = #tpu.dot_dimension_numbers<[1], [0], [0], [1], [0, 0, 1, 1], [], []>} : vector<256x3xf32>, vector<3x8xf32>, vector<256x8xf32> -> vector<256x8xf32>
    %36 = arith.addf %30, %35 : vector<256x8xf32>
    %c0_42 = arith.constant 0 : index
    %c2_43 = arith.constant 2 : index
    %c0_44 = arith.constant 0 : index
    %c0_45 = arith.constant 0 : index
    %37 = vector.load %arg1[%c0_42, %c2_43, %c0_44, %c0_45] : memref<1x18x18x3xf32, #tpu.memory_space<vmem>>, vector<1x16x16x3xf32>
    %38 = vector.shape_cast %37 : vector<1x16x16x3xf32> to vector<256x3xf32>
    %c6 = arith.constant 6 : index
    %c0_46 = arith.constant 0 : index
    %c0_47 = arith.constant 0 : index
    %39 = vector.load %arg2[%c6, %c0_46, %c0_47] : memref<9x3x8xf32, #tpu.memory_space<vmem>>, vector<1x3x8xf32>
    %40 = vector.shape_cast %39 : vector<1x3x8xf32> to vector<3x8xf32>
    %cst_48 = arith.constant dense<0.000000e+00> : vector<256x8xf32>
    %41 = tpu.matmul %38, %40, %cst_48 {dimension_numbers = #tpu.dot_dimension_numbers<[1], [0], [0], [1], [0, 0, 1, 1], [], []>} : vector<256x3xf32>, vector<3x8xf32>, vector<256x8xf32> -> vector<256x8xf32>
    %42 = arith.addf %36, %41 : vector<256x8xf32>
    %c0_49 = arith.constant 0 : index
    %c2_50 = arith.constant 2 : index
    %c1_51 = arith.constant 1 : index
    %c0_52 = arith.constant 0 : index
    %43 = vector.load %arg1[%c0_49, %c2_50, %c1_51, %c0_52] : memref<1x18x18x3xf32, #tpu.memory_space<vmem>>, vector<1x16x16x3xf32>
    %44 = vector.shape_cast %43 : vector<1x16x16x3xf32> to vector<256x3xf32>
    %c7 = arith.constant 7 : index
    %c0_53 = arith.constant 0 : index
    %c0_54 = arith.constant 0 : index
    %45 = vector.load %arg2[%c7, %c0_53, %c0_54] : memref<9x3x8xf32, #tpu.memory_space<vmem>>, vector<1x3x8xf32>
    %46 = vector.shape_cast %45 : vector<1x3x8xf32> to vector<3x8xf32>
    %cst_55 = arith.constant dense<0.000000e+00> : vector<256x8xf32>
    %47 = tpu.matmul %44, %46, %cst_55 {dimension_numbers = #tpu.dot_dimension_numbers<[1], [0], [0], [1], [0, 0, 1, 1], [], []>} : vector<256x3xf32>, vector<3x8xf32>, vector<256x8xf32> -> vector<256x8xf32>
    %48 = arith.addf %42, %47 : vector<256x8xf32>
    %c0_56 = arith.constant 0 : index
    %c2_57 = arith.constant 2 : index
    %c2_58 = arith.constant 2 : index
    %c0_59 = arith.constant 0 : index
    %49 = vector.load %arg1[%c0_56, %c2_57, %c2_58, %c0_59] : memref<1x18x18x3xf32, #tpu.memory_space<vmem>>, vector<1x16x16x3xf32>
    %50 = vector.shape_cast %49 : vector<1x16x16x3xf32> to vector<256x3xf32>
    %c8 = arith.constant 8 : index
    %c0_60 = arith.constant 0 : index
    %c0_61 = arith.constant 0 : index
    %51 = vector.load %arg2[%c8, %c0_60, %c0_61] : memref<9x3x8xf32, #tpu.memory_space<vmem>>, vector<1x3x8xf32>
    %52 = vector.shape_cast %51 : vector<1x3x8xf32> to vector<3x8xf32>
    %cst_62 = arith.constant dense<0.000000e+00> : vector<256x8xf32>
    %53 = tpu.matmul %50, %52, %cst_62 {dimension_numbers = #tpu.dot_dimension_numbers<[1], [0], [0], [1], [0, 0, 1, 1], [], []>} : vector<256x3xf32>, vector<3x8xf32>, vector<256x8xf32> -> vector<256x8xf32>
    %54 = arith.addf %48, %53 : vector<256x8xf32>
    %c0_63 = arith.constant 0 : index
    %c0_64 = arith.constant 0 : index
    %55 = vector.load %arg3[%c0_63, %c0_64] : memref<1x8xf32, #tpu.memory_space<vmem>>, vector<1x8xf32>
    %56 = vector.broadcast %55 : vector<1x8xf32> to vector<256x8xf32>
    %57 = arith.addf %54, %56 : vector<256x8xf32>
    %cst_65 = arith.constant 0.000000e+00 : f32
    %58 = vector.broadcast %cst_65 : f32 to vector<256x8xf32>
    %59 = arith.maximumf %57, %58 : vector<256x8xf32>
    %60 = arith.truncf %59 : vector<256x8xf32> to vector<256x8xbf16>
    %c0_66 = arith.constant 0 : index
    %c0_67 = arith.constant 0 : index
    %61 = vector.load %arg4[%c0_66, %c0_67] : memref<256x8xbf16, #tpu.memory_space<vmem>>, vector<256x8xbf16>
    tpu.vector_store %arg4[%c0_66, %c0_67], %60 {strides = array<i32>} : memref<256x8xbf16, #tpu.memory_space<vmem>>, vector<256x8xbf16>,
    return
  }
  func.func @transform_0(%arg0: i32) -> (i32, i32, i32, i32) {
    %c0_i32 = arith.constant 0 : i32
    %c0_i32_0 = arith.constant 0 : i32
    %c0_i32_1 = arith.constant 0 : i32
    %c0_i32_2 = arith.constant 0 : i32
    return %arg0, %c0_i32, %c0_i32_0, %c0_i32_1 : i32, i32, i32, i32
  }
  func.func @transform_1(%arg0: i32) -> (i32, i32, i32) {
    %c0_i32 = arith.constant 0 : i32
    %c0_i32_0 = arith.constant 0 : i32
    %c0_i32_1 = arith.constant 0 : i32
    %c0_i32_2 = arith.constant 0 : i32
    return %c0_i32, %c0_i32_0, %c0_i32_1 : i32, i32, i32
  }
  func.func @transform_2(%arg0: i32) -> (i32, i32) {
    %c0_i32 = arith.constant 0 : i32
    %c0_i32_0 = arith.constant 0 : i32
    %c0_i32_1 = arith.constant 0 : i32
    return %c0_i32, %c0_i32_0 : i32, i32
  }
  func.func @transform_3(%arg0: i32) -> (i32, i32) {
    %c0_i32 = arith.constant 0 : i32
    %c0_i32_0 = arith.constant 0 : i32
    return %arg0, %c0_i32 : i32, i32
  }
}

module attributes {stable_mosaic.version = 11 : i64} {
  func.func @_mlp_kernel(%arg0: i32, %arg1: memref<2x2048xbf16, #tpu.memory_space<vmem>>, %arg2: memref<2048x128xbf16, #tpu.memory_space<vmem>>, %arg3: memref<1x128xf32, #tpu.memory_space<vmem>>, %arg4: memref<128x128xbf16, #tpu.memory_space<vmem>>, %arg5: memref<1x128xf32, #tpu.memory_space<vmem>>, %arg6: memref<128x128xbf16, #tpu.memory_space<vmem>>, %arg7: memref<1x128xf32, #tpu.memory_space<vmem>>, %arg8: memref<128x128xbf16, #tpu.memory_space<vmem>>, %arg9: memref<1x128xf32, #tpu.memory_space<vmem>>, %arg10: memref<2x128xf32, #tpu.memory_space<vmem>>, %arg11: memref<2x128xf32, #tpu.memory_space<vmem>>) attributes {dimension_semantics = [#tpu.dimension_semantics<parallel>], iteration_bounds = array<i64: 1>, scalar_prefetch = 0 : i64, scratch_operands = 0 : i64, tpu.core_type = #tpu.core_type<tc>, window_params = [{transform_indices = @transform_0, window_bounds = array<i64: 2, 2048>}, {pipeline_mode = #tpu.pipeline_mode<synchronous>, transform_indices = @transform_1, window_bounds = array<i64: 2048, 128>}, {pipeline_mode = #tpu.pipeline_mode<synchronous>, transform_indices = @transform_2, window_bounds = array<i64: 1, 128>}, {pipeline_mode = #tpu.pipeline_mode<synchronous>, transform_indices = @transform_3, window_bounds = array<i64: 128, 128>}, {pipeline_mode = #tpu.pipeline_mode<synchronous>, transform_indices = @transform_4, window_bounds = array<i64: 1, 128>}, {pipeline_mode = #tpu.pipeline_mode<synchronous>, transform_indices = @transform_5, window_bounds = array<i64: 128, 128>}, {pipeline_mode = #tpu.pipeline_mode<synchronous>, transform_indices = @transform_6, window_bounds = array<i64: 1, 128>}, {pipeline_mode = #tpu.pipeline_mode<synchronous>, transform_indices = @transform_7, window_bounds = array<i64: 128, 128>}, {pipeline_mode = #tpu.pipeline_mode<synchronous>, transform_indices = @transform_8, window_bounds = array<i64: 1, 128>}, {transform_indices = @transform_9, window_bounds = array<i64: 2, 128>}, {transform_indices = @transform_10, window_bounds = array<i64: 2, 128>}]} {
    %c0 = arith.constant 0 : index
    %c0_0 = arith.constant 0 : index
    %0 = vector.load %arg1[%c0, %c0_0] : memref<2x2048xbf16, #tpu.memory_space<vmem>>, vector<2x2048xbf16>
    %c0_1 = arith.constant 0 : index
    %c0_2 = arith.constant 0 : index
    %1 = vector.load %arg2[%c0_1, %c0_2] : memref<2048x128xbf16, #tpu.memory_space<vmem>>, vector<2048x128xbf16>
    %cst = arith.constant dense<0.000000e+00> : vector<2x128xf32>
    %2 = tpu.matmul %0, %1, %cst {dimension_numbers = #tpu.dot_dimension_numbers<[1], [0], [0], [1], [0, 0, 1, 1], [], []>} : vector<2x2048xbf16>, vector<2048x128xbf16>, vector<2x128xf32> -> vector<2x128xf32>
    %c0_3 = arith.constant 0 : index
    %c0_4 = arith.constant 0 : index
    %3 = vector.load %arg3[%c0_3, %c0_4] : memref<1x128xf32, #tpu.memory_space<vmem>>, vector<1x128xf32>
    %4 = vector.broadcast %3 : vector<1x128xf32> to vector<2x128xf32>
    %5 = arith.addf %2, %4 : vector<2x128xf32>
    %cst_5 = arith.constant 0.000000e+00 : f32
    %6 = vector.broadcast %cst_5 : f32 to vector<2x128xf32>
    %7 = arith.maximumf %5, %6 : vector<2x128xf32>
    %8 = arith.truncf %7 : vector<2x128xf32> to vector<2x128xbf16>
    %c0_6 = arith.constant 0 : index
    %c0_7 = arith.constant 0 : index
    %9 = vector.load %arg4[%c0_6, %c0_7] : memref<128x128xbf16, #tpu.memory_space<vmem>>, vector<128x128xbf16>
    %cst_8 = arith.constant dense<0.000000e+00> : vector<2x128xf32>
    %10 = tpu.matmul %8, %9, %cst_8 {dimension_numbers = #tpu.dot_dimension_numbers<[1], [0], [0], [1], [0, 0, 1, 1], [], []>} : vector<2x128xbf16>, vector<128x128xbf16>, vector<2x128xf32> -> vector<2x128xf32>
    %c0_9 = arith.constant 0 : index
    %c0_10 = arith.constant 0 : index
    %11 = vector.load %arg5[%c0_9, %c0_10] : memref<1x128xf32, #tpu.memory_space<vmem>>, vector<1x128xf32>
    %12 = vector.broadcast %11 : vector<1x128xf32> to vector<2x128xf32>
    %13 = arith.addf %10, %12 : vector<2x128xf32>
    %c0_11 = arith.constant 0 : index
    %c0_12 = arith.constant 0 : index
    %14 = vector.load %arg11[%c0_11, %c0_12] : memref<2x128xf32, #tpu.memory_space<vmem>>, vector<2x128xf32>
    tpu.vector_store %arg11[%c0_11, %c0_12], %13 {strides = array<i32>} : memref<2x128xf32, #tpu.memory_space<vmem>>, vector<2x128xf32>,
    %15 = arith.truncf %13 : vector<2x128xf32> to vector<2x128xbf16>
    %c0_13 = arith.constant 0 : index
    %c0_14 = arith.constant 0 : index
    %16 = vector.load %arg6[%c0_13, %c0_14] : memref<128x128xbf16, #tpu.memory_space<vmem>>, vector<128x128xbf16>
    %cst_15 = arith.constant dense<0.000000e+00> : vector<2x128xf32>
    %17 = tpu.matmul %15, %16, %cst_15 {dimension_numbers = #tpu.dot_dimension_numbers<[1], [0], [0], [1], [0, 0, 1, 1], [], []>} : vector<2x128xbf16>, vector<128x128xbf16>, vector<2x128xf32> -> vector<2x128xf32>
    %c0_16 = arith.constant 0 : index
    %c0_17 = arith.constant 0 : index
    %18 = vector.load %arg7[%c0_16, %c0_17] : memref<1x128xf32, #tpu.memory_space<vmem>>, vector<1x128xf32>
    %19 = vector.broadcast %18 : vector<1x128xf32> to vector<2x128xf32>
    %20 = arith.addf %17, %19 : vector<2x128xf32>
    %cst_18 = arith.constant 0.000000e+00 : f32
    %21 = vector.broadcast %cst_18 : f32 to vector<2x128xf32>
    %22 = arith.maximumf %20, %21 : vector<2x128xf32>
    %23 = arith.truncf %22 : vector<2x128xf32> to vector<2x128xbf16>
    %c0_19 = arith.constant 0 : index
    %c0_20 = arith.constant 0 : index
    %24 = vector.load %arg8[%c0_19, %c0_20] : memref<128x128xbf16, #tpu.memory_space<vmem>>, vector<128x128xbf16>
    %cst_21 = arith.constant dense<0.000000e+00> : vector<2x128xf32>
    %25 = tpu.matmul %23, %24, %cst_21 {dimension_numbers = #tpu.dot_dimension_numbers<[1], [0], [0], [1], [0, 0, 1, 1], [], []>} : vector<2x128xbf16>, vector<128x128xbf16>, vector<2x128xf32> -> vector<2x128xf32>
    %c0_22 = arith.constant 0 : index
    %c0_23 = arith.constant 0 : index
    %26 = vector.load %arg9[%c0_22, %c0_23] : memref<1x128xf32, #tpu.memory_space<vmem>>, vector<1x128xf32>
    %27 = vector.broadcast %26 : vector<1x128xf32> to vector<2x128xf32>
    %28 = arith.addf %25, %27 : vector<2x128xf32>
    %c0_24 = arith.constant 0 : index
    %c0_25 = arith.constant 0 : index
    %29 = vector.load %arg10[%c0_24, %c0_25] : memref<2x128xf32, #tpu.memory_space<vmem>>, vector<2x128xf32>
    tpu.vector_store %arg10[%c0_24, %c0_25], %28 {strides = array<i32>} : memref<2x128xf32, #tpu.memory_space<vmem>>, vector<2x128xf32>,
    return
  }
  func.func @transform_0(%arg0: i32) -> (i32, i32) {
    %c0_i32 = arith.constant 0 : i32
    %c0_i32_0 = arith.constant 0 : i32
    return %arg0, %c0_i32 : i32, i32
  }
  func.func @transform_1(%arg0: i32) -> (i32, i32) {
    %c0_i32 = arith.constant 0 : i32
    %c0_i32_0 = arith.constant 0 : i32
    %c0_i32_1 = arith.constant 0 : i32
    return %c0_i32, %c0_i32_0 : i32, i32
  }
  func.func @transform_2(%arg0: i32) -> (i32, i32) {
    %c0_i32 = arith.constant 0 : i32
    %c0_i32_0 = arith.constant 0 : i32
    %c0_i32_1 = arith.constant 0 : i32
    return %c0_i32, %c0_i32_0 : i32, i32
  }
  func.func @transform_3(%arg0: i32) -> (i32, i32) {
    %c0_i32 = arith.constant 0 : i32
    %c0_i32_0 = arith.constant 0 : i32
    %c0_i32_1 = arith.constant 0 : i32
    return %c0_i32, %c0_i32_0 : i32, i32
  }
  func.func @transform_4(%arg0: i32) -> (i32, i32) {
    %c0_i32 = arith.constant 0 : i32
    %c0_i32_0 = arith.constant 0 : i32
    %c0_i32_1 = arith.constant 0 : i32
    return %c0_i32, %c0_i32_0 : i32, i32
  }
  func.func @transform_5(%arg0: i32) -> (i32, i32) {
    %c0_i32 = arith.constant 0 : i32
    %c0_i32_0 = arith.constant 0 : i32
    %c0_i32_1 = arith.constant 0 : i32
    return %c0_i32, %c0_i32_0 : i32, i32
  }
  func.func @transform_6(%arg0: i32) -> (i32, i32) {
    %c0_i32 = arith.constant 0 : i32
    %c0_i32_0 = arith.constant 0 : i32
    %c0_i32_1 = arith.constant 0 : i32
    return %c0_i32, %c0_i32_0 : i32, i32
  }
  func.func @transform_7(%arg0: i32) -> (i32, i32) {
    %c0_i32 = arith.constant 0 : i32
    %c0_i32_0 = arith.constant 0 : i32
    %c0_i32_1 = arith.constant 0 : i32
    return %c0_i32, %c0_i32_0 : i32, i32
  }
  func.func @transform_8(%arg0: i32) -> (i32, i32) {
    %c0_i32 = arith.constant 0 : i32
    %c0_i32_0 = arith.constant 0 : i32
    %c0_i32_1 = arith.constant 0 : i32
    return %c0_i32, %c0_i32_0 : i32, i32
  }
  func.func @transform_9(%arg0: i32) -> (i32, i32) {
    %c0_i32 = arith.constant 0 : i32
    %c0_i32_0 = arith.constant 0 : i32
    return %arg0, %c0_i32 : i32, i32
  }
  func.func @transform_10(%arg0: i32) -> (i32, i32) {
    %c0_i32 = arith.constant 0 : i32
    %c0_i32_0 = arith.constant 0 : i32
    return %arg0, %c0_i32 : i32, i32
  }
}

</mosaic_0001>

<bundles_post_ra>
// kernel: cbm_forward.3
= control target key start
LH: loop header
LB: loop body
LE: loop exit
PB: predicated region body
PF: predicated region fallthrough
CT: control target
= control target key end

     0   :  { %16 = vsyncpa [#allocation3], 0  ;;  %v308_v28 = vlaneseq  ;;  %v2500_v36 = vmov 1966171168   ;;  %s3112_s0 = inlined_call_operand.vmem [shape: bf16[2,2048], index: 0, kind: input, shape index: {}]   ;;  %s3113_s1 = inlined_call_operand.vmem [shape: bf16[2048,128], index: 1, kind: input, shape index: {}]   ;;  %s3114_s2 = inlined_call_operand.vmem [shape: f32[1,128], index: 2, kind: input, shape index: {}]   ;;  %s3115_s3 = inlined_call_operand.vmem [shape: bf16[128,128], index: 3, kind: input, shape index: {}]   ;;  %s3116_s4 = inlined_call_operand.vmem [shape: f32[1,128], index: 4, kind: input, shape index: {}]   ;;  %s3117_s5 = inlined_call_operand.vmem [shape: bf16[128,128], index: 5, kind: input, shape index: {}]   ;;  %s3118_s6 = inlined_call_operand.vmem [shape: f32[1,128], index: 6, kind: input, shape index: {}]   ;;  %s3119_s7 = inlined_call_operand.vmem [shape: bf16[128,128], index: 7, kind: input, shape index: {}]   ;;  %s3120_s8 = inlined_call_operand.vmem [shape: f32[1,128], index: 8, kind: input, shape index: {}]   ;;  %s3121_s9 = inlined_call_operand.hbm [shape: f32[2,128], index: 9, kind: output, shape index: {0}]   ;;  %s3122_s10 = inlined_call_operand.hbm [shape: f32[2,128], index: 10, kind: output, shape index: {1}]  }
   0x1   :  { %v2298_v0 = vld [vmem:[%s3113_s1 + $0x40] sm:$0xff]   ;;  %v2302_v4 = vld [vmem:[%s3113_s1 + $0x48] sm:$0xff]   ;;  %v2306_v8 = vld [vmem:[%s3113_s1 + $0x50] sm:$0xff]   ;;  %v306_v37 = vunpack.c.l.s4 %v2500_v36 }
   0x2   :  { %v2299_v1 = vld [vmem:[%s3113_s1 + $0xc0] sm:$0xff]   ;;  %2030 = vmatprep.subr.bf16.mxu0 %v2298_v0  ;;  %v2303_v5 = vld [vmem:[%s3113_s1 + $0xc8] sm:$0xff]   ;;  %v2307_v9 = vld [vmem:[%s3113_s1 + $0xd0] sm:$0xff]   ;;  %v309_v33 = vshrl.u32 %v308_v28, 7 }
   0x3   :  { %v2300_v2 = vld [vmem:[%s3113_s1] sm:$0xff]   ;;  %2052 = vmatprep.subr.bf16.mxu1 %v2299_v1  ;;  %v2304_v6 = vld [vmem:[%s3113_s1 + $0x8] sm:$0xff]   ;;  %v2308_v10 = vld [vmem:[%s3113_s1 + $0x10] sm:$0xff]   ;;  %v307_v40 = vunpack.c.0.s8 %v306_v37 }
   0x4   :  { %v2301_v3 = vld [vmem:[%s3113_s1 + $0x80] sm:$0xff]   ;;  %2031 = vmatpush3.bf16.msra.mxu0 %v2300_v2  ;;  %v2305_v7 = vld [vmem:[%s3113_s1 + $0x88] sm:$0xff]   ;;  %v2309_v11 = vld [vmem:[%s3113_s1 + $0x90] sm:$0xff]  }
   0x5   :  { %2053 = vmatpush3.bf16.msra.mxu1 %v2301_v3  ;;  %2032 = vmatprep.subr.bf16.mxu0 %v2302_v4  ;;  %v2310_v12 = vld [vmem:[%s3113_s1 + $0x58] sm:$0xff]   ;;  %v2314_v16 = vld [vmem:[%s3113_s1 + $0x60] sm:$0xff]   ;;  %v2318_v20 = vld [vmem:[%s3113_s1 + $0x68] sm:$0xff]   ;;  %v2665_v41 = vsub.s32 %v307_v40, %v309_v33 }
   0x6   :  { %2054 = vmatprep.subr.bf16.mxu1 %v2303_v5  ;;  %v2311_v13 = vld [vmem:[%s3113_s1 + $0xd8] sm:$0xff]   ;;  %v2315_v17 = vld [vmem:[%s3113_s1 + $0xe0] sm:$0xff]   ;;  %v2319_v21 = vld [vmem:[%s3113_s1 + $0xe8] sm:$0xff]  }
   0x7   :  { %v2312_v14 = vld [vmem:[%s3113_s1 + $0x18] sm:$0xff]   ;;  %v2316_v18 = vld [vmem:[%s3113_s1 + $0x20] sm:$0xff]   ;;  %v2320_v22 = vld [vmem:[%s3113_s1 + $0x28] sm:$0xff]  }
   0x8   :  { %2033 = vmatpush3.bf16.msra.mxu0 %v2304_v6  ;;  %v2313_v15 = vld [vmem:[%s3113_s1 + $0x98] sm:$0xff]   ;;  %v2317_v19 = vld [vmem:[%s3113_s1 + $0xa0] sm:$0xff]   ;;  %v2321_v23 = vld [vmem:[%s3113_s1 + $0xa8] sm:$0xff]  }
   0x9   :  { %2055 = vmatpush3.bf16.msra.mxu1 %v2305_v7  ;;  %2034 = vmatprep.subr.bf16.mxu0 %v2306_v8  ;;  %v2322_v24 = vld [vmem:[%s3113_s1 + $0x70] sm:$0xff]   ;;  %v2326_v29 = vld [vmem:[%s3113_s1 + $0x78] sm:$0xff]   ;;  %v37_v34 = vld [vmem:[%s3112_s0] sm:$0xff] }
   0xa   :  { %2056 = vmatprep.subr.bf16.mxu1 %v2307_v9  ;;  %v2323_v25 = vld [vmem:[%s3113_s1 + $0xf0] sm:$0xff]   ;;  %v2327_v30 = vld [vmem:[%s3113_s1 + $0xf8] sm:$0xff]   ;;  %v2331_v35 = vld [vmem:[%s3113_s1 + $0x140] sm:$0xff]   ;;  %v304_v39 = vcombine.high %v37_v34, %v37_v34  ;;  %v311_v42 = vrot.slane %v37_v34, %v2665_v41 }
   0xb   :  { %v2324_v26 = vld [vmem:[%s3113_s1 + $0x30] sm:$0xff]   ;;  %v2328_v31 = vld [vmem:[%s3113_s1 + $0x38] sm:$0xff]   ;;  %v2332_v38 = vld [vmem:[%s3113_s1 + $0x1c0] sm:$0xff]  }
   0xc   :  { %2035 = vmatpush3.bf16.msra.mxu0 %v2308_v10  ;;  %v2325_v27 = vld [vmem:[%s3113_s1 + $0xb0] sm:$0xff]   ;;  %v2329_v32 = vld [vmem:[%s3113_s1 + $0xb8] sm:$0xff]   ;;  %v2669_v43 = vrot.slane %v304_v39, %v2665_v41  ;;  %v319_v44 = vcombine.high %v311_v42, %v311_v42  ;;  %v327_v45 = vrot.slane %v311_v42, %v2665_v41  ;;  %v2333_v47 = vld [vmem:[%s3113_s1 + $0x100] sm:$0xff]  }
   0xd   :  { %2057 = vmatpush3.bf16.msra.mxu1 %v2309_v11  ;;  %2036 = vmatprep.subr.bf16.mxu0 %v2310_v12  ;;  %v2334_v49 = vld [vmem:[%s3113_s1 + $0x180] sm:$0xff]   ;;  %v2335_v52 = vld [vmem:[%s3113_s1 + $0x148] sm:$0xff]   ;;  %v2339_v58 = vld [vmem:[%s3113_s1 + $0x150] sm:$0xff]  }
   0xe   :  { %2058 = vmatprep.subr.bf16.mxu1 %v2311_v13  ;;  %v320_v46 = vcombine.high %v2669_v43, %v2669_v43  ;;  %v341_v48 = vrot.slane %v319_v44, %v2665_v41  ;;  %v349_v51 = vcombine.high %v327_v45, %v327_v45  ;;  %v2336_v54 = vld [vmem:[%s3113_s1 + $0x1c8] sm:$0xff]   ;;  %v2340_v59 = vld [vmem:[%s3113_s1 + $0x1d0] sm:$0xff]   ;;  %v2343_v62 = vld [vmem:[%s3113_s1 + $0x158] sm:$0xff]  }
   0xf   :  { %v2337_v55 = vld [vmem:[%s3113_s1 + $0x108] sm:$0xff]   ;;  %v2341_v60 = vld [vmem:[%s3113_s1 + $0x110] sm:$0xff]   ;;  %v2344_v63 = vld [vmem:[%s3113_s1 + $0x1d8] sm:$0xff]  }
  0x10   :  { %2037 = vmatpush3.bf16.msra.mxu0 %v2312_v14  ;;  %v348_v50 = vrot.slane %v320_v46, %v2665_v41  ;;  %1218 = vmatprep.mubr.bf16.mxu0 %v341_v48  ;;  %v351_v53 = vcombine.high %v341_v48, %v341_v48  ;;  %v2338_v57 = vld [vmem:[%s3113_s1 + $0x188] sm:$0xff]   ;;  %v2342_v61 = vld [vmem:[%s3113_s1 + $0x190] sm:$0xff]   ;;  %v2345_v0 = vld [vmem:[%s3113_s1 + $0x118] sm:$0xff]  }
  0x11   :  { %2059 = vmatpush3.bf16.msra.mxu1 %v2313_v15  ;;  %2038 = vmatprep.subr.bf16.mxu0 %v2314_v16  ;;  %v2346_v1 = vld [vmem:[%s3113_s1 + $0x198] sm:$0xff]   ;;  %v2347_v2 = vld [vmem:[%s3113_s1 + $0x160] sm:$0xff]   ;;  %v2351_v6 = vld [vmem:[%s3113_s1 + $0x168] sm:$0xff]  }
  0x12   :  { %2060 = vmatprep.subr.bf16.mxu1 %v2315_v17  ;;  %v352_v56 = vcombine.high %v348_v50, %v348_v50  ;;  %1258 = vmatprep.mubr.bf16.mxu1 %v351_v53  ;;  %v2348_v3 = vld [vmem:[%s3113_s1 + $0x1e0] sm:$0xff]   ;;  %v2352_v7 = vld [vmem:[%s3113_s1 + $0x1e8] sm:$0xff]   ;;  %v2355_v10 = vld [vmem:[%s3113_s1 + $0x170] sm:$0xff]  }
  0x13   :  { %v2349_v4 = vld [vmem:[%s3113_s1 + $0x120] sm:$0xff]   ;;  %v2353_v8 = vld [vmem:[%s3113_s1 + $0x128] sm:$0xff]   ;;  %v2356_v11 = vld [vmem:[%s3113_s1 + $0x1f0] sm:$0xff]  }
  0x14   :  { %2039 = vmatpush3.bf16.msra.mxu0 %v2316_v18  ;;  %v2350_v5 = vld [vmem:[%s3113_s1 + $0x1a0] sm:$0xff]   ;;  %v2354_v9 = vld [vmem:[%s3113_s1 + $0x1a8] sm:$0xff]   ;;  %v2357_v12 = vld [vmem:[%s3113_s1 + $0x130] sm:$0xff]   ;;  %v334_v18 = vrot.slane %v2669_v43, %v2665_v41 }
  0x15   :  { %2061 = vmatpush3.bf16.msra.mxu1 %v2317_v19  ;;  %2040 = vmatprep.subr.bf16.mxu0 %v2318_v20  ;;  %v2358_v13 = vld [vmem:[%s3113_s1 + $0x1b0] sm:$0xff]   ;;  %v2359_v14 = vld [vmem:[%s3113_s1 + $0x178] sm:$0xff]   ;;  %v2363_v19 = vld [vmem:[%s3113_s1 + $0x240] sm:$0xff]  }
  0x16   :  { %2062 = vmatprep.subr.bf16.mxu1 %v2319_v21  ;;  %v2360_v15 = vld [vmem:[%s3113_s1 + $0x1f8] sm:$0xff]   ;;  %v2364_v20 = vld [vmem:[%s3113_s1 + $0x2c0] sm:$0xff]   ;;  %v2371_v28 = vld [vmem:[%s3113_s1 + $0x250] sm:$0xff]  }
  0x17   :  { %v2361_v16 = vld [vmem:[%s3113_s1 + $0x138] sm:$0xff]   ;;  %v2365_v21 = vld [vmem:[%s3113_s1 + $0x200] sm:$0xff]   ;;  %v2383_v40 = vld [vmem:[%s3113_s1 + $0x268] sm:$0xff]  }
  0x18   :  { %2041 = vmatpush3.bf16.msra.mxu0 %v2320_v22  ;;  %v2362_v17 = vld [vmem:[%s3113_s1 + $0x1b8] sm:$0xff]   ;;  %v2366_v22 = vld [vmem:[%s3113_s1 + $0x280] sm:$0xff]   ;;  %v2384_v42 = vld [vmem:[%s3113_s1 + $0x2e8] sm:$0xff]  }
  0x19   :  { %2063 = vmatpush3.bf16.msra.mxu1 %v2321_v23  ;;  %2042 = vmatprep.subr.bf16.mxu0 %v2322_v24  ;;  %v350_v23 = vcombine.high %v334_v18, %v334_v18  ;;  %v2367_v24 = vld [vmem:[%s3113_s1 + $0x248] sm:$0xff]   ;;  %v2376_v33 = vld [vmem:[%s3113_s1 + $0x2d8] sm:$0xff]   ;;  %v2379_v36 = vld [vmem:[%s3113_s1 + $0x260] sm:$0xff]  }
  0x1a   :  { %2064 = vmatprep.subr.bf16.mxu1 %v2323_v25  ;;  %v2368_v25 = vld [vmem:[%s3113_s1 + $0x2c8] sm:$0xff]   ;;  %v2377_v34 = vld [vmem:[%s3113_s1 + $0x218] sm:$0xff]   ;;  %v2380_v37 = vld [vmem:[%s3113_s1 + $0x2e0] sm:$0xff]  }
  0x1b   :  { %v2382_v39 = vld [vmem:[%s3113_s1 + $0x2a0] sm:$0xff]   ;;  %v2385_v43 = vld [vmem:[%s3113_s1 + $0x228] sm:$0xff]  }
  0x1c   :  { %2043 = vmatpush3.bf16.msra.mxu0 %v2324_v26  ;;  %v2369_v26 = vld [vmem:[%s3113_s1 + $0x208] sm:$0xff]  }
  0x1d   :  { %2065 = vmatpush3.bf16.msra.mxu1 %v2325_v27  ;;  %2044 = vmatprep.subr.bf16.mxu0 %v2326_v29  ;;  %v2370_v27 = vld [vmem:[%s3113_s1 + $0x288] sm:$0xff]   ;;  %v2372_v29 = vld [vmem:[%s3113_s1 + $0x2d0] sm:$0xff]  }
  0x1e   :  { %2066 = vmatprep.subr.bf16.mxu1 %v2327_v30  ;;  %v2373_v30 = vld [vmem:[%s3113_s1 + $0x210] sm:$0xff]   ;;  %v2386_v44 = vld [vmem:[%s3113_s1 + $0x2a8] sm:$0xff]  }
  0x1f   :  { %v38_v46 = vld [vmem:[%s3112_s0 + $0x8] sm:$0xff] }
  0x20   :  { %2045 = vmatpush3.bf16.msra.mxu0 %v2328_v31  ;;  %v2374_v31 = vld [vmem:[%s3113_s1 + $0x290] sm:$0xff]   ;;  %v360_v48 = vrot.slane %v38_v46, %v2665_v41 }
  0x21   :  { %2067 = vmatpush3.bf16.msra.mxu1 %v2329_v32  ;;  %2074 = vmatprep.subr.bf16.mxu0 %v2331_v35  ;;  %v2375_v32 = vld [vmem:[%s3113_s1 + $0x258] sm:$0xff]  }
  0x22   :  { %2096 = vmatprep.subr.bf16.mxu1 %v2332_v38  ;;  %v2378_v35 = vld [vmem:[%s3113_s1 + $0x298] sm:$0xff]   ;;  %v2381_v38 = vld [vmem:[%s3113_s1 + $0x220] sm:$0xff]  }
  0x23   :  { %1219 = vmatmul.mubr.bf16.vlgmr.msra.gmra.mrb[0].mxu0 %v327_v45  ;;  %v2387_v45 = vld [vmem:[%s3113_s1 + $0x270] sm:$0xff]  }
  0x24   :  { %2075 = vmatpush3.bf16.msra.mxu0 %v2333_v47  ;;  %1259 = vmatmul.mubr.bf16.vlgmr.msra.gmra.mrb[0].mxu1 %v349_v51  ;;  %v2388_v47 = vld [vmem:[%s3113_s1 + $0x2f0] sm:$0xff]  }
  0x25   :  { %2076 = vmatprep.subr.bf16.mxu0 %v2335_v52  ;;  %2097 = vmatpush3.bf16.msra.mxu1 %v2334_v49  ;;  %v353_v49 = vcombine.high %v38_v46, %v38_v46  ;;  %v2390_v51 = vld [vmem:[%s3113_s1 + $0x2b0] sm:$0xff]   ;;  %v368_v52 = vcombine.high %v360_v48, %v360_v48 }
  0x26   :  { %1298 = vmatprep.mubr.bf16.mxu0 %v348_v50  ;;  %2098 = vmatprep.subr.bf16.mxu1 %v2336_v54  ;;  %v2389_v50 = vld [vmem:[%s3113_s1 + $0x230] sm:$0xff]   ;;  %v2391_v54 = vld [vmem:[%s3113_s1 + $0x278] sm:$0xff]  }
  0x27   :  { %1338 = vmatprep.mubr.bf16.mxu1 %v352_v56  ;;  %v2857_v53 = vrot.slane %v353_v49, %v2665_v41  ;;  %v390_v56 = vrot.slane %v368_v52, %v2665_v41 }
  0x28   :  { %2077 = vmatpush3.bf16.msra.mxu0 %v2337_v55  ;;  %v2392_v55 = vld [vmem:[%s3113_s1 + $0x2f8] sm:$0xff]  }
  0x29   :  { %2078 = vmatprep.subr.bf16.mxu0 %v2339_v58  ;;  %2099 = vmatpush3.bf16.msra.mxu1 %v2338_v57  ;;  %v369_v57 = vcombine.high %v2857_v53, %v2857_v53  ;;  %v2393_v58 = vld [vmem:[%s3113_s1 + $0x238] sm:$0xff]  }
  0x2a   :  { %2100 = vmatprep.subr.bf16.mxu1 %v2340_v59  ;;  %v2394_v59 = vld [vmem:[%s3113_s1 + $0x2b8] sm:$0xff]  }
  0x2c   :  { %2079 = vmatpush3.bf16.msra.mxu0 %v2341_v60  ;;  %v400_v60 = vcombine.high %v390_v56, %v390_v56 }
  0x2d   :  { %2080 = vmatprep.subr.bf16.mxu0 %v2343_v62  ;;  %2101 = vmatpush3.bf16.msra.mxu1 %v2342_v61  ;;  %v376_v61 = vrot.slane %v360_v48, %v2665_v41  ;;  %v2395_v62 = vld [vmem:[%s3113_s1 + $0x340] sm:$0xff]  }
  0x2e   :  { %2102 = vmatprep.subr.bf16.mxu1 %v2344_v63  ;;  %v2396_v63 = vld [vmem:[%s3113_s1 + $0x3c0] sm:$0xff]  }
  0x30   :  { %2081 = vmatpush3.bf16.msra.mxu0 %v2345_v0  ;;  %v397_v0 = vrot.slane %v369_v57, %v2665_v41 }
  0x31   :  { %2082 = vmatprep.subr.bf16.mxu0 %v2347_v2  ;;  %2103 = vmatpush3.bf16.msra.mxu1 %v2346_v1  ;;  %v2397_v1 = vld [vmem:[%s3113_s1 + $0x300] sm:$0xff]  }
  0x32   :  { %2104 = vmatprep.subr.bf16.mxu1 %v2348_v3  ;;  %v2398_v2 = vld [vmem:[%s3113_s1 + $0x380] sm:$0xff]   ;;  %v398_v3 = vcombine.high %v376_v61, %v376_v61 }
  0x34   :  { %2083 = vmatpush3.bf16.msra.mxu0 %v2349_v4  ;;  %v2399_v4 = vld [vmem:[%s3113_s1 + $0x348] sm:$0xff]  }
  0x35   :  { %2084 = vmatprep.subr.bf16.mxu0 %v2351_v6  ;;  %2105 = vmatpush3.bf16.msra.mxu1 %v2350_v5  ;;  %v2400_v5 = vld [vmem:[%s3113_s1 + $0x3c8] sm:$0xff]   ;;  %v401_v6 = vcombine.high %v397_v0, %v397_v0 }
  0x36   :  { %2106 = vmatprep.subr.bf16.mxu1 %v2352_v7  ;;  %v2401_v7 = vld [vmem:[%s3113_s1 + $0x308] sm:$0xff]  }
  0x38   :  { %2085 = vmatpush3.bf16.msra.mxu0 %v2353_v8  ;;  %v2402_v8 = vld [vmem:[%s3113_s1 + $0x388] sm:$0xff]  }
  0x39   :  { %2086 = vmatprep.subr.bf16.mxu0 %v2355_v10  ;;  %2107 = vmatpush3.bf16.msra.mxu1 %v2354_v9  ;;  %v2403_v9 = vld [vmem:[%s3113_s1 + $0x350] sm:$0xff]  }
  0x3a   :  { %2108 = vmatprep.subr.bf16.mxu1 %v2356_v11  ;;  %v2404_v10 = vld [vmem:[%s3113_s1 + $0x3d0] sm:$0xff]  }
  0x3b   :  { %v2405_v11 = vld [vmem:[%s3113_s1 + $0x310] sm:$0xff]  }
  0x3c   :  { %2087 = vmatpush3.bf16.msra.mxu0 %v2357_v12  ;;  %v2406_v12 = vld [vmem:[%s3113_s1 + $0x390] sm:$0xff]  }
  0x3d   :  { %2088 = vmatprep.subr.bf16.mxu0 %v2359_v14  ;;  %2109 = vmatpush3.bf16.msra.mxu1 %v2358_v13  ;;  %v2407_v13 = vld [vmem:[%s3113_s1 + $0x358] sm:$0xff]  }
  0x3e   :  { %2110 = vmatprep.subr.bf16.mxu1 %v2360_v15  ;;  %v2408_v14 = vld [vmem:[%s3113_s1 + $0x3d8] sm:$0xff]  }
  0x3f   :  { %v2409_v15 = vld [vmem:[%s3113_s1 + $0x318] sm:$0xff]  }
  0x40   :  { %2089 = vmatpush3.bf16.msra.mxu0 %v2361_v16  ;;  %v2410_v16 = vld [vmem:[%s3113_s1 + $0x398] sm:$0xff]  }
  0x41   :  { %2118 = vmatprep.subr.bf16.mxu0 %v2363_v19  ;;  %2111 = vmatpush3.bf16.msra.mxu1 %v2362_v17  ;;  %v2411_v17 = vld [vmem:[%s3113_s1 + $0x360] sm:$0xff]  }
  0x42   :  { %2140 = vmatprep.subr.bf16.mxu1 %v2364_v20  ;;  %v2413_v19 = vld [vmem:[%s3113_s1 + $0x320] sm:$0xff]  }
  0x43   :  { %1299 = vmatmul.mubr.bf16.vlgmr.msra.gmra.mrb[4].mxu0 %v334_v18  ;;  %v2412_v18 = vld [vmem:[%s3113_s1 + $0x3e0] sm:$0xff]  }
  0x44   :  { %2119 = vmatpush3.bf16.msra.mxu0 %v2365_v21  ;;  %1339 = vmatmul.mubr.bf16.vlgmr.msra.gmra.mrb[4].mxu1 %v350_v23  ;;  %v2414_v20 = vld [vmem:[%s3113_s1 + $0x3a0] sm:$0xff]   ;;  %v2415_v21 = vld [vmem:[%s3113_s1 + $0x368] sm:$0xff]  }
  0x45   :  { %2120 = vmatprep.subr.bf16.mxu0 %v2367_v24  ;;  %2141 = vmatpush3.bf16.msra.mxu1 %v2366_v22  ;;  %v2416_v22 = vld [vmem:[%s3113_s1 + $0x3e8] sm:$0xff]  }
  0x46   :  { %2142 = vmatprep.subr.bf16.mxu1 %v2368_v25  ;;  %1378 = vmatprep.mubr.bf16.mxu0 %v390_v56  ;;  %v2417_v23 = vld [vmem:[%s3113_s1 + $0x328] sm:$0xff]   ;;  %v2419_v25 = vld [vmem:[%s3113_s1 + $0x370] sm:$0xff]  }
  0x47   :  { %1418 = vmatprep.mubr.bf16.mxu1 %v400_v60  ;;  %v2418_v24 = vld [vmem:[%s3113_s1 + $0x3a8] sm:$0xff]  }
  0x48   :  { %2121 = vmatpush3.bf16.msra.mxu0 %v2369_v26  ;;  %v2420_v26 = vld [vmem:[%s3113_s1 + $0x3f0] sm:$0xff]  }
  0x49   :  { %2122 = vmatprep.subr.bf16.mxu0 %v2371_v28  ;;  %2143 = vmatpush3.bf16.msra.mxu1 %v2370_v27  ;;  %v2421_v27 = vld [vmem:[%s3113_s1 + $0x330] sm:$0xff]  }
  0x4a   :  { %2144 = vmatprep.subr.bf16.mxu1 %v2372_v29  ;;  %v2422_v28 = vld [vmem:[%s3113_s1 + $0x3b0] sm:$0xff]   ;;  %v2423_v29 = vld [vmem:[%s3113_s1 + $0x378] sm:$0xff]  }
  0x4c   :  { %2123 = vmatpush3.bf16.msra.mxu0 %v2373_v30  ;;  %v2424_v30 = vld [vmem:[%s3113_s1 + $0x3f8] sm:$0xff]  }
  0x4d   :  { %2124 = vmatprep.subr.bf16.mxu0 %v2375_v32  ;;  %2145 = vmatpush3.bf16.msra.mxu1 %v2374_v31  ;;  %v2425_v31 = vld [vmem:[%s3113_s1 + $0x338] sm:$0xff]  }
  0x4e   :  { %2146 = vmatprep.subr.bf16.mxu1 %v2376_v33  ;;  %v2426_v32 = vld [vmem:[%s3113_s1 + $0x3b8] sm:$0xff]   ;;  %v383_v33 = vrot.slane %v2857_v53, %v2665_v41 }
  0x50   :  { %2125 = vmatpush3.bf16.msra.mxu0 %v2377_v34  ;;  %v399_v34 = vcombine.high %v383_v33, %v383_v33 }
  0x51   :  { %2126 = vmatprep.subr.bf16.mxu0 %v2379_v36  ;;  %2147 = vmatpush3.bf16.msra.mxu1 %v2378_v35 }
  0x52   :  { %2148 = vmatprep.subr.bf16.mxu1 %v2380_v37 }
  0x54   :  { %2127 = vmatpush3.bf16.msra.mxu0 %v2381_v38 }
  0x55   :  { %2128 = vmatprep.subr.bf16.mxu0 %v2383_v40  ;;  %2149 = vmatpush3.bf16.msra.mxu1 %v2382_v39 }
  0x56   :  { %2150 = vmatprep.subr.bf16.mxu1 %v2384_v42 }
  0x58   :  { %2129 = vmatpush3.bf16.msra.mxu0 %v2385_v43 }
  0x59   :  { %2130 = vmatprep.subr.bf16.mxu0 %v2387_v45  ;;  %2151 = vmatpush3.bf16.msra.mxu1 %v2386_v44 }
  0x5a   :  { %2152 = vmatprep.subr.bf16.mxu1 %v2388_v47 }
  0x5c   :  { %2131 = vmatpush3.bf16.msra.mxu0 %v2389_v50 }
  0x5d   :  { %2132 = vmatprep.subr.bf16.mxu0 %v2391_v54  ;;  %2153 = vmatpush3.bf16.msra.mxu1 %v2390_v51 }
  0x5e   :  { %2154 = vmatprep.subr.bf16.mxu1 %v2392_v55 }
  0x60   :  { %2133 = vmatpush3.bf16.msra.mxu0 %v2393_v58 }
  0x61   :  { %2162 = vmatprep.subr.bf16.mxu0 %v2395_v62  ;;  %2155 = vmatpush3.bf16.msra.mxu1 %v2394_v59 }
  0x62   :  { %2184 = vmatprep.subr.bf16.mxu1 %v2396_v63 }
  0x63   :  { %1379 = vmatmul.mubr.bf16.vlgmr.msra.gmra.mrb[8].mxu0 %v376_v61 }
  0x64   :  { %2163 = vmatpush3.bf16.msra.mxu0 %v2397_v1  ;;  %1458 = vmatprep.mubr.bf16.mxu0 %v397_v0 }
  0x65   :  { %1419 = vmatmul.mubr.bf16.vlgmr.msra.gmra.mrb[8].mxu1 %v398_v3  ;;  %2164 = vmatprep.subr.bf16.mxu0 %v2399_v4 }
  0x66   :  { %2185 = vmatpush3.bf16.msra.mxu1 %v2398_v2  ;;  %1498 = vmatprep.mubr.bf16.mxu1 %v401_v6 }
  0x67   :  { %2186 = vmatprep.subr.bf16.mxu1 %v2400_v5 }
  0x68   :  { %2165 = vmatpush3.bf16.msra.mxu0 %v2401_v7 }
  0x69   :  { %2166 = vmatprep.subr.bf16.mxu0 %v2403_v9 }
  0x6a   :  { %2187 = vmatpush3.bf16.msra.mxu1 %v2402_v8 }
  0x6b   :  { %2188 = vmatprep.subr.bf16.mxu1 %v2404_v10 }
  0x6c   :  { %2167 = vmatpush3.bf16.msra.mxu0 %v2405_v11 }
  0x6d   :  { %2168 = vmatprep.subr.bf16.mxu0 %v2407_v13 }
  0x6e   :  { %2189 = vmatpush3.bf16.msra.mxu1 %v2406_v12 }
  0x6f   :  { %2190 = vmatprep.subr.bf16.mxu1 %v2408_v14 }
  0x70   :  { %2169 = vmatpush3.bf16.msra.mxu0 %v2409_v15 }
  0x71   :  { %2170 = vmatprep.subr.bf16.mxu0 %v2411_v17 }
  0x72   :  { %2191 = vmatpush3.bf16.msra.mxu1 %v2410_v16 }
  0x73   :  { %2192 = vmatprep.subr.bf16.mxu1 %v2412_v18 }
  0x74   :  { %2171 = vmatpush3.bf16.msra.mxu0 %v2413_v19 }
  0x75   :  { %2172 = vmatprep.subr.bf16.mxu0 %v2415_v21 }
  0x76   :  { %2193 = vmatpush3.bf16.msra.mxu1 %v2414_v20 }
  0x77   :  { %2194 = vmatprep.subr.bf16.mxu1 %v2416_v22 }
  0x78   :  { %2173 = vmatpush3.bf16.msra.mxu0 %v2417_v23 }
  0x79   :  { %2174 = vmatprep.subr.bf16.mxu0 %v2419_v25 }
  0x7a   :  { %2195 = vmatpush3.bf16.msra.mxu1 %v2418_v24 }
  0x7b   :  { %2196 = vmatprep.subr.bf16.mxu1 %v2420_v26 }
  0x7c   :  { %2175 = vmatpush3.bf16.msra.mxu0 %v2421_v27 }
  0x7d   :  { %2176 = vmatprep.subr.bf16.mxu0 %v2423_v29 }
  0x7e   :  { %2197 = vmatpush3.bf16.msra.mxu1 %v2422_v28 }
  0x7f   :  { %2198 = vmatprep.subr.bf16.mxu1 %v2424_v30 }
  0x80   :  { %2177 = vmatpush3.bf16.msra.mxu0 %v2425_v31 }
  0x82   :  { %2199 = vmatpush3.bf16.msra.mxu1 %v2426_v32 }
  0x83   :  { %1459 = vmatmul.mubr.bf16.vlgmr.msra.gmra.mrb[12].mxu0 %v383_v33 }
  0x85   :  { %1499 = vmatmul.mubr.bf16.vlgmr.msra.gmra.mrb[12].mxu1 %v399_v34 }
  0x86   :  { %17 = vsyncpa [#allocation5], 0  ;;  %v2428_v35 = vld [vmem:[%s3115_s3] sm:$0xff]   ;;  %v2501_v36 = vmov 0.0   ;;  %v2429_v41 = vld [vmem:[%s3115_s3 + $0x8] sm:$0xff]   ;;  %vm2502_vm0 = vmmov 0  }
  0x87   :  { %2233 = vmatprep.subr.bf16.mxu0 %v2501_v36  ;;  %2253 = vmatprep.subr.bf16.mxu1 %v2501_v36  ;;  %v2430_v37 = vld [vmem:[%s3115_s3 + $0x10] sm:$0xff]   ;;  %v2431_v38 = vld [vmem:[%s3115_s3 + $0x18] sm:$0xff]   ;;  %v2432_v39 = vld [vmem:[%s3115_s3 + $0x20] sm:$0xff]   ;;  %s2503_s13 = smov [#allocation4]  }
  0x88   :  { %2234 = vmatpush3.bf16.msra.mxu0 %v2428_v35  ;;  %v2433_v40 = vld [vmem:[%s3115_s3 + $0x28] sm:$0xff]   ;;  %v2434_v42 = vld [vmem:[%s3115_s3 + $0x30] sm:$0xff]   ;;  %v2435_v43 = vld [vmem:[%s3115_s3 + $0x38] sm:$0xff]   ;;  %2249 = vmatprep.mubr.msk.bf16.mxu0 %vm2502_vm0, %v2501_v36  ;;  %s1862_s14 = sshll.u32 %s2503_s13, 4  ;;  %s1863_s14 = int_to_ptr.vmem [resolvable:$true] %s1862_s14 }
  0x89   :  { %2235 = vmatprep.subr.bf16.mxu0 %v2501_v36  ;;  %v2436_v44 = vld [vmem:[%s3117_s5] sm:$0xff]   ;;  %2269 = vmatprep.mubr.msk.bf16.mxu1 %vm2502_vm0, %v2501_v36  ;;  %v2437_v45 = vld [vmem:[%s3117_s5 + $0x8] sm:$0xff]   ;;  %v2438_v46 = vld [vmem:[%s3117_s5 + $0x10] sm:$0xff]   ;;  %s2452_s15 = scalar_lea.vmem %s1863_s14, 32  ;;  %p2457_p1 = scmp.lt.s32.totalorder %s1863_s14, %s1863_s14 }
  0x8a   :  { %2254 = vmatpush3.bf16.msra.mxu1 %v2436_v44  ;;  %v2439_v47 = vld [vmem:[%s3117_s5 + $0x18] sm:$0xff]   ;;  %v2440_v48 = vld [vmem:[%s3117_s5 + $0x20] sm:$0xff]   ;;  %v2441_v49 = vld [vmem:[%s3117_s5 + $0x28] sm:$0xff]   ;;  %p2453_p0 = scmp.ne.s32.totalorder %s1863_s14, %s2452_s15  ;;  %p2458_p2 = scmp.lt.s32.totalorder %s2452_s15, %s2452_s15 }
  0x8b   :  { %2255 = vmatprep.subr.bf16.mxu1 %v2501_v36  ;;  %v1874_v51 = vld [vmem:[%s3114_s2] ss:$0 sm:$0xff]  ;;  %v2442_v56 = vld [vmem:[%s3117_s5 + $0x30] sm:$0xff]  }
  0x8c   :  { %2236 = vmatpush3.bf16.msra.mxu0 %v2429_v41  ;;  %v2448_v44 = vld [vmem:[%s3119_s7 + $0x20] sm:$0xff]   ;;  %p2459_p3 = por %p2458_p2, %p2457_p1 }
  0x8d   :  { %2237 = vmatprep.subr.bf16.mxu0 %v2501_v36 }
  0x8e   :  { %2256 = vmatpush3.bf16.msra.mxu1 %v2437_v45  ;;  %v2449_v45 = vld [vmem:[%s3119_s7 + $0x28] sm:$0xff]   ;;  %p2460_p4 = pnand %p2459_p3, %p2453_p0 }
  0x8f   :  { %2257 = vmatprep.subr.bf16.mxu1 %v2501_v36 }
  0x90   :  { %2238 = vmatpush3.bf16.msra.mxu0 %v2430_v37 }
  0x91   :  { %2239 = vmatprep.subr.bf16.mxu0 %v2501_v36 }
  0x92   :  { %2258 = vmatpush3.bf16.msra.mxu1 %v2438_v46  ;;  %v2003_v46 = vld [vmem:[%s3116_s4] ss:$0 sm:$0xff] }
  0x93   :  { %2259 = vmatprep.subr.bf16.mxu1 %v2501_v36 }
  0x94   :  { %2240 = vmatpush3.bf16.msra.mxu0 %v2431_v38  ;;  %v2443_v38 = vld [vmem:[%s3117_s5 + $0x38] sm:$0xff]  }
  0x95   :  { %2241 = vmatprep.subr.bf16.mxu0 %v2501_v36 }
  0x96   :  { %2260 = vmatpush3.bf16.msra.mxu1 %v2439_v47 }
  0x97   :  { %2261 = vmatprep.subr.bf16.mxu1 %v2501_v36 }
  0x98   :  { %2242 = vmatpush3.bf16.msra.mxu0 %v2432_v39  ;;  %v2444_v39 = vld [vmem:[%s3119_s7] sm:$0xff]  }
  0x99   :  { %2243 = vmatprep.subr.bf16.mxu0 %v2501_v36 }
  0x9a   :  { %2262 = vmatpush3.bf16.msra.mxu1 %v2440_v48 }
  0x9b   :  { %2263 = vmatprep.subr.bf16.mxu1 %v2501_v36 }
  0x9c   :  { %2244 = vmatpush3.bf16.msra.mxu0 %v2433_v40  ;;  %v2445_v40 = vld [vmem:[%s3119_s7 + $0x8] sm:$0xff]  }
  0x9d   :  { %2245 = vmatprep.subr.bf16.mxu0 %v2501_v36 }
  0x9e   :  { %2264 = vmatpush3.bf16.msra.mxu1 %v2441_v49 }
  0x9f   :  { %2265 = vmatprep.subr.bf16.mxu1 %v2501_v36 }
  0xa0   :  { %2246 = vmatpush3.bf16.msra.mxu0 %v2434_v42  ;;  %v2446_v42 = vld [vmem:[%s3119_s7 + $0x10] sm:$0xff]  }
  0xa1   :  { %2247 = vmatprep.subr.bf16.mxu0 %v2501_v36 }
  0xa2   :  { %2266 = vmatpush3.bf16.msra.mxu1 %v2442_v56 }
  0xa3   :  { %2267 = vmatprep.subr.bf16.mxu1 %v2501_v36 }
  0xa4   :  { %2248 = vmatpush3.bf16.msra.mxu0 %v2435_v43  ;;  %v2447_v43 = vld [vmem:[%s3119_s7 + $0x18] sm:$0xff]  }
  0xa5   :  { %2273 = vmatprep.subr.bf16.mxu0 %v2501_v36 }
  0xa6   :  { %2268 = vmatpush3.bf16.msra.mxu1 %v2443_v38 }
  0xf6   :  { %v2046_v50 = vpop.f32.mrb[0].mxu0 }
  0xf7   :  { %v2047_v52 = vpop.f32.mrb[1].mxu0  ;;  %v2068_v53 = vpop.f32.mrb[0].mxu1 }
  0xf8   :  { %v2048_v54 = vadd.f32 %v2047_v52, %v2046_v50  ;;  %v2049_v55 = vpop.f32.mrb[2].mxu0  ;;  %v2069_v57 = vpop.f32.mrb[1].mxu1 }
  0xf9   :  { %v2050_v58 = vpop.f32.mrb[3].mxu0  ;;  %v2070_v60 = vadd.f32 %v2069_v57, %v2068_v53  ;;  %v2071_v61 = vpop.f32.mrb[2].mxu1  ;;  %v2450_v53 = vld [vmem:[%s3119_s7 + $0x30] sm:$0xff]   ;;  %v2012_v55 = vld [vmem:[%s3118_s6] ss:$0 sm:$0xff] }
  0xfa   :  { %v1221_v59 = vadd.f32 %v2048_v54, %v1874_v51  ;;  %v2072_v62 = vpop.f32.mrb[3].mxu1  ;;  %v2451_v54 = vld [vmem:[%s3119_s7 + $0x38] sm:$0xff]  }
  0xfc   :  { %v1261_v63 = vadd.f32 %v2070_v60, %v1221_v59 }
 0x116   :  { %v2090_v0 = vpop.f32.mrb[4].mxu0 }
 0x117   :  { %v2091_v1 = vpop.f32.mrb[5].mxu0  ;;  %v2112_v2 = vpop.f32.mrb[4].mxu1 }
 0x118   :  { %v2092_v3 = vadd.f32 %v2091_v1, %v2090_v0  ;;  %v2093_v4 = vpop.f32.mrb[6].mxu0  ;;  %v2113_v5 = vpop.f32.mrb[5].mxu1 }
 0x119   :  { %v2094_v6 = vpop.f32.mrb[7].mxu0  ;;  %v2114_v8 = vadd.f32 %v2113_v5, %v2112_v2  ;;  %v2115_v9 = vpop.f32.mrb[6].mxu1 }
 0x11a   :  { %v1301_v7 = vadd.f32 %v2092_v3, %v1261_v63  ;;  %v2116_v10 = vpop.f32.mrb[7].mxu1 }
 0x11c   :  { %v1341_v11 = vadd.f32 %v2114_v8, %v1301_v7 }
 0x136   :  { %v2134_v12 = vpop.f32.mrb[8].mxu0 }
 0x137   :  { %v2135_v13 = vpop.f32.mrb[9].mxu0 }
 0x138   :  { %v2156_v14 = vpop.f32.mrb[8].mxu1  ;;  %v2136_v15 = vadd.f32 %v2135_v13, %v2134_v12  ;;  %v2137_v16 = vpop.f32.mrb[10].mxu0 }
 0x139   :  { %v2157_v17 = vpop.f32.mrb[9].mxu1  ;;  %v2138_v18 = vpop.f32.mrb[11].mxu0 }
 0x13a   :  { %v1381_v19 = vadd.f32 %v2136_v15, %v1341_v11  ;;  %v2158_v20 = vadd.f32 %v2157_v17, %v2156_v14  ;;  %v2159_v21 = vpop.f32.mrb[10].mxu1 }
 0x13b   :  { %v2160_v22 = vpop.f32.mrb[11].mxu1 }
 0x13c   :  { %v1421_v23 = vadd.f32 %v2158_v20, %v1381_v19 }
 0x156   :  { %v2178_v24 = vpop.f32.mrb[12].mxu0 }
 0x157   :  { %v2179_v25 = vpop.f32.mrb[13].mxu0 }
 0x158   :  { %v2200_v26 = vpop.f32.mrb[12].mxu1  ;;  %v2180_v27 = vadd.f32 %v2179_v25, %v2178_v24  ;;  %v2181_v28 = vpop.f32.mrb[14].mxu0 }
 0x159   :  { %v2201_v29 = vpop.f32.mrb[13].mxu1  ;;  %v2182_v30 = vpop.f32.mrb[15].mxu0 }
 0x15a   :  { %v1461_v31 = vadd.f32 %v2180_v27, %v1421_v23  ;;  %v2202_v32 = vadd.f32 %v2201_v29, %v2200_v26  ;;  %v2203_v33 = vpop.f32.mrb[14].mxu1 }
 0x15b   :  { %v2204_v34 = vpop.f32.mrb[15].mxu1 }
 0x15c   :  { %v1501_v35 = vadd.f32 %v2202_v32, %v1461_v31 }
 0x15e   :  { %v1506_v41 = vmax.f32 %v1501_v35, 0.0 }
 0x160   :  { %v1507_v37 = vpack.c.bf16 %v1506_v41, %v1506_v41 }
 0x162   :  { %2250 = vmatmul.mubr.bf16.vlgmr.msra.gmra.mrb[16].mxu0 %v1507_v37 }
 0x163   :  { %2289 = vmatprep.mubr.msk.bf16.mxu0 %vm2502_vm0, %v2501_v36  ;;  %2274 = vmatpush3.bf16.msra.mxu0 %v2444_v39 }
 0x164   :  { %2275 = vmatprep.subr.bf16.mxu0 %v2501_v36 }
 0x167   :  { %2276 = vmatpush3.bf16.msra.mxu0 %v2445_v40 }
 0x168   :  { %2277 = vmatprep.subr.bf16.mxu0 %v2501_v36 }
 0x16b   :  { %2278 = vmatpush3.bf16.msra.mxu0 %v2446_v42 }
 0x16c   :  { %2279 = vmatprep.subr.bf16.mxu0 %v2501_v36 }
 0x16f   :  { %2280 = vmatpush3.bf16.msra.mxu0 %v2447_v43 }
 0x170   :  { %2281 = vmatprep.subr.bf16.mxu0 %v2501_v36 }
 0x173   :  { %2282 = vmatpush3.bf16.msra.mxu0 %v2448_v44 }
 0x174   :  { %2283 = vmatprep.subr.bf16.mxu0 %v2501_v36 }
 0x177   :  { %2284 = vmatpush3.bf16.msra.mxu0 %v2449_v45 }
 0x178   :  { %2285 = vmatprep.subr.bf16.mxu0 %v2501_v36 }
 0x17b   :  { %2286 = vmatpush3.bf16.msra.mxu0 %v2450_v53 }
 0x17c   :  { %2287 = vmatprep.subr.bf16.mxu0 %v2501_v36 }
 0x17f   :  { %2288 = vmatpush3.bf16.msra.mxu0 %v2451_v54 }
 0x235   :  { %v1613_v47 = vpop.f32.mrb[16].mxu0 }
 0x236   :  { %v1614_v48 = vadd.f32 %v2003_v46, %v1613_v47  ;;  %v2251_v49 = vpop.f32.mrb[17].mxu0 }
 0x237   :  { %v1616_v50 = vpop.f32.mrb[18].mxu0 }
 0x238   :  { %v1620_v51 = vpack.c.bf16 %v1614_v48, %v1614_v48  ;;  %1619 = vst [vmem:[#allocation4] sm:$0x3] %v1614_v48  ;;  %v2252_v52 = vpop.f32.mrb[19].mxu0 }
 0x23a   :  { %2270 = vmatmul.mubr.bf16.vlgmr.msra.gmra.mrb[16].mxu1 %v1620_v51 }
 0x30d   :  { %v1726_v56 = vpop.f32.mrb[16].mxu1 }
 0x30e   :  { %v1727_v57 = vadd.f32 %v2012_v55, %v1726_v56  ;;  %v2271_v58 = vpop.f32.mrb[17].mxu1 }
 0x30f   :  { %v1729_v59 = vpop.f32.mrb[18].mxu1 }
 0x310   :  { %v1732_v60 = vmax.f32 %v1727_v57, 0.0  ;;  %v2272_v61 = vpop.f32.mrb[19].mxu1 }
 0x312   :  { %v1733_v62 = vpack.c.bf16 %v1732_v60, %v1732_v60 }
 0x314   :  { %2290 = vmatmul.mubr.bf16.vlgmr.msra.gmra.mrb[20].mxu0 %v1733_v62 }
 0x315   :  { %2463 = shalt.err (!%p2460_p4)
}
 0x316   :  { %s2464_s16 = scalar_lea.hbm %s3122_s10, 32 }
 0x317   :  { %p2465_p5 = scmp.ne.s32.totalorder %s3122_s10, %s2464_s16  ;;  %p2468_p6 = scmp.lt.u32.totalorder %s2464_s16, %s3122_s10 }
 0x319   :  { %p2470_p7 = pnand %p2468_p6, %p2465_p5 }
 0x31b   :  { %2473 = shalt.err (!%p2470_p7)
}
 0x31c   :  { %1865 = dma.vmem_to_hbm [thread:$0]  %s1863_s14, 32, %s3122_s10, [#allocation5]   ;;  %v2021_v36 = vld [vmem:[%s3120_s8] ss:$0 sm:$0xff] }
 0x31d   :  { %s2504_s5 = smov [#allocation2]  }
 0x31e   :  { %s1852_s23 = sshll.u32 %s2504_s5, 4  ;;  %s1853_s23 = int_to_ptr.vmem [resolvable:$true] %s1852_s23 }
 0x31f   :  { %s2474_s24 = scalar_lea.vmem %s1853_s23, 32  ;;  %p2479_p9 = scmp.lt.s32.totalorder %s1853_s23, %s1853_s23 }
 0x320   :  { %p2475_p8 = scmp.ne.s32.totalorder %s1853_s23, %s2474_s24  ;;  %p2480_p10 = scmp.lt.s32.totalorder %s2474_s24, %s2474_s24 }
 0x322   :  { %p2481_p11 = por %p2480_p10, %p2479_p9 }
 0x324   :  { %p2482_p12 = pnand %p2481_p11, %p2475_p8 }
 0x3e7   :  { %v1839_v63 = vpop.f32.mrb[20].mxu0 }
 0x3e8   :  { %v1840_v0 = vadd.f32 %v2021_v36, %v1839_v63  ;;  %v2291_v1 = vpop.f32.mrb[21].mxu0 }
 0x3e9   :  { %v1842_v2 = vpop.f32.mrb[22].mxu0 }
 0x3ea   :  { %1845 = vst [vmem:[#allocation2] sm:$0x3] %v1840_v0  ;;  %v2292_v3 = vpop.f32.mrb[23].mxu0 }
 0x3eb   :  { %2485 = shalt.err (!%p2482_p12)
}
 0x3ec   :  { %s2486_s8 = scalar_lea.hbm %s3121_s9, 32 }
 0x3ed   :  { %p2487_p13 = scmp.ne.s32.totalorder %s3121_s9, %s2486_s8  ;;  %p2490_p0 = scmp.lt.u32.totalorder %s2486_s8, %s3121_s9 }
 0x3ef   :  { %p2492_p1 = pnand %p2490_p0, %p2487_p13 }
 0x3f1   :  { %2495 = shalt.err (!%p2492_p1)
}
 0x3f2   :  { %1855 = dma.vmem_to_hbm [thread:$0]  %s1853_s23, 32, %s3121_s9, [#allocation3]  }
 0x3f3   :  { %2496 = dma.done.wait [#allocation3], 32  }
 0x3f4   :  { %2497 = vsyncadd [#allocation3], 4294967264 }
 0x3f5   :  { %2498 = dma.done.wait [#allocation5], 32  }
 0x3f6   :  { %2499 = vsyncadd [#allocation5], 4294967264 }
 0x3f7   :  { %1872 = vsyncpa [#allocation3], 1 }
 0x3f8   :  { %1873 = vsyncpa [#allocation5], 1 }

// kernel: cbm_forward.2
= control target key start
LH: loop header
LB: loop body
LE: loop exit
PB: predicated region body
PF: predicated region fallthrough
CT: control target
= control target key end

     0   :  { %s5523_s12 = smov 0   ;;  %s6593_s0 = inlined_call_operand.vmem [shape: f32[2,18,18,3], index: 0, kind: input, shape index: {}]   ;;  %s6594_s1 = inlined_call_operand.vmem [shape: f32[9,3,8], index: 1, kind: input, shape index: {}]   ;;  %s6595_s2 = inlined_call_operand.vmem [shape: f32[1,8], index: 2, kind: input, shape index: {}]   ;;  %s6596_s3 = inlined_call_operand.vmem [shape: bf16[512,8], index: 3, kind: output, shape index: {}]  }
   0x1 LB: > { %s5529_s13 = sadd.s32 4294967295, %s5501_s12   ;;  %p3913_p0 = scmp.ge.s32.totalorder %s5501_s12, 1  ;;  %s5501_s12 = sphi %s5523_s12, %s13_s12  }
   0x2   : > { %p137_p1 = scmp.lt.s32.totalorder %s5501_s12, 3 }
   0x4   : > { %p138_p2 = pnand %p3913_p0, %p137_p1 }
   0x6   : > { %141 = sbr.rel (%p138_p2) target bundleno = 528 (0x210), region = 32 }
   0xd   : > { %v3917_v0 = vld [vmem:[%s6594_s1 + $0x4] sm:$0x7]  ;;  %vm336_vm0 = vcmask 1042432   ;;  %v5539_v1 = vld [vmem:[%s6594_s1 + $0x10] sm:$0x7]  ;;  %p161_p3 = scmp.lt.s32.totalorder %s5529_s13, 1 }
   0xe   : > { %4778 = vmatprep.subr.msk.mxu1 %vm336_vm0, %v3917_v0  ;;  %4978 = vmatprep.subr.msk.mxu0 %vm336_vm0, %v5539_v1  ;;  %v204_v2 = vld [vmem:[%s6594_s1] sm:$0x7]  ;;  %v4182_v3 = vld [vmem:[%s6594_s1 + $0x14] sm:$0x7]  ;;  %vm239_vm1 = vcmask 23552   ;;  %s3915_s10 = sshll.u32 %s5529_s13, 5 }
   0xf   : > { %4779 = vmatpush3.msk.msra.mxu1 %vm336_vm0, %v3917_v0  ;;  %4979 = vmatpush3.msk.msra.mxu0 %vm336_vm0, %v5539_v1  ;;  %s162_s22 = scalar_select %p161_p3, %s5529_s13, 1  ;;  %v4248_v9 = vld [vmem:[%s6594_s1 + $0x18] sm:$0x7]  ;;  %v5579_v10 = vld [vmem:[%s6594_s1 + $0x8] sm:$0x7]  ;;  %vm3820_vm2 = vcmask 60416  }
  0x10   : > { %4828 = vmatprep.subr.msk.mxu1 %vm336_vm0, %v204_v2  ;;  %5028 = vmatprep.subr.msk.mxu0 %vm336_vm0, %v4182_v3  ;;  %v5698_v28 = vld [vmem:[%s6594_s1 + $0x1c] sm:$0x7]  ;;  %v5861_v61 = vld [vmem:[%s6594_s1 + $0xc] sm:$0x7]  ;;  %p167_p4 = scmp.lt.s32.totalorder %s3915_s10, 63 }
  0x11   : > { %s5486_s23 = smul.u32 432, %s162_s22 }
  0x12   : > { %s6707_s10 = smov (!%p167_p4, %s3915_s10), 63 }
  0x13   : > { %s5560_s26 = scalar_lea.vmem %s6593_s0, %s5486_s23  ;;  %s3916_s15 = sshll.u32 %s6707_s10, 2 }
  0x14   : > { %v205_v4 = vld [vmem:[%s5560_s26 + $0x1] sm:$0xff]  ;;  %v4084_v5 = vld [vmem:[%s5560_s26 + $0x19] sm:$0xff]  ;;  %v206_v6 = vld [vmem:[%s5560_s26 + $0x9] sm:$0xff]  ;;  %s6488_s17 = scalar_lea.vmem %s6596_s3, %s3916_s15 }
  0x15   : > { %4780 = vmatprep.mubr.msk.f32.mxu1 %vm239_vm1, %v205_v4  ;;  %4980 = vmatprep.mubr.msk.f32.mxu0 %vm239_vm1, %v4084_v5  ;;  %v4085_v7 = vld [vmem:[%s5560_s26 + $0x21] sm:$0xff]  ;;  %v5569_v8 = vld [vmem:[%s5560_s26 + $0x31] sm:$0xff]  ;;  %v5584_v11 = vld [vmem:[%s5560_s26 + $0x39] sm:$0xff] }
  0x16   : > { %4781 = vmatmul.mubr.msk.f32.vlgmr.msra.gmra.mrb[0].mxu1 %vm239_vm1, %v206_v6  ;;  %4981 = vmatmul.mubr.msk.f32.vlgmr.msra.gmra.mrb[0].mxu0 %vm239_vm1, %v4085_v7  ;;  %v5590_v12 = vld [vmem:[%s5560_s26 + $0x49] sm:$0xff]  ;;  %v5603_v13 = vld [vmem:[%s5560_s26 + $0x51] sm:$0xff]  ;;  %v5606_v14 = vld [vmem:[%s5560_s26 + $0x61] sm:$0xff] }
  0x17   : > { %4829 = vmatpush3.msk.msra.mxu1 %vm336_vm0, %v204_v2  ;;  %5029 = vmatpush3.msk.msra.mxu0 %vm336_vm0, %v4182_v3  ;;  %v5617_v15 = vld [vmem:[%s5560_s26 + $0x69] sm:$0xff]  ;;  %v5620_v16 = vld [vmem:[%s5560_s26 + $0x79] sm:$0xff]  ;;  %v5631_v17 = vld [vmem:[%s5560_s26 + $0x81] sm:$0xff] }
  0x18   : > { %4783 = vmatprep.mubr.msk.f32.mxu1 %vm239_vm1, %v4084_v5  ;;  %4983 = vmatprep.mubr.msk.f32.mxu0 %vm239_vm1, %v5569_v8  ;;  %v5634_v18 = vld [vmem:[%s5560_s26 + $0x91] sm:$0xff]  ;;  %v5645_v19 = vld [vmem:[%s5560_s26 + $0x99] sm:$0xff]  ;;  %v5648_v20 = vld [vmem:[%s5560_s26 + $0xa9] sm:$0xff] }
  0x19   : > { %5078 = vmatprep.subr.msk.mxu0 %vm336_vm0, %v4248_v9  ;;  %4878 = vmatprep.subr.msk.mxu1 %vm336_vm0, %v5579_v10  ;;  %v5659_v21 = vld [vmem:[%s5560_s26 + $0xb1] sm:$0xff]  ;;  %v5662_v22 = vld [vmem:[%s5560_s26 + $0xc1] sm:$0xff]  ;;  %v5673_v23 = vld [vmem:[%s5560_s26 + $0xc9] sm:$0xff] }
  0x1a   : > { %4784 = vmatmul.mubr.msk.f32.gmra.mrb[2].mxu1 %vm239_vm1, %v4085_v7  ;;  %4984 = vmatmul.mubr.msk.f32.gmra.mrb[2].mxu0 %vm239_vm1, %v5584_v11  ;;  %v5676_v24 = vld [vmem:[%s5560_s26 + $0x1a] sm:$0xff]  ;;  %v5687_v25 = vld [vmem:[%s5560_s26 + $0x22] sm:$0xff]  ;;  %v5693_v27 = vld [vmem:[%s5560_s26 + $0x32] sm:$0xff] }
  0x1b   : > { %4786 = vmatprep.mubr.msk.f32.mxu1 %vm239_vm1, %v5569_v8  ;;  %4986 = vmatprep.mubr.msk.f32.mxu0 %vm239_vm1, %v5590_v12  ;;  %v5690_v26 = vld [vmem:[%s5560_s26 + $0xd9] sm:$0xff]  ;;  %v5708_v29 = vld [vmem:[%s5560_s26 + $0xe1] sm:$0xff]  ;;  %v5716_v31 = vld [vmem:[%s5560_s26 + $0xf1] sm:$0xff] }
  0x1c   : > { %6642 = vst [vmem:[#allocation2_spill] sm:$0xff] %v5708_v29  ;;  %v5711_v30 = vld [vmem:[%s5560_s26 + $0x3a] sm:$0xff]  ;;  %6643 = vst [vmem:[#allocation3_spill] sm:$0xff] %v5716_v31  ;;  %v5719_v32 = vld [vmem:[%s5560_s26 + $0x4a] sm:$0xff] }
  0x1d   : > { %v5732_v33 = vld [vmem:[%s5560_s26 + $0xf9] sm:$0xff]  ;;  %v5738_v35 = vld [vmem:[%s5560_s26 + $0x109] sm:$0xff]  ;;  %v5752_v37 = vld [vmem:[%s5560_s26 + $0x111] sm:$0xff] }
  0x1e   : > { %4787 = vmatmul.mubr.msk.f32.gmra.mrb[4].mxu1 %vm239_vm1, %v5584_v11  ;;  %4987 = vmatmul.mubr.msk.f32.gmra.mrb[4].mxu0 %vm239_vm1, %v5603_v13  ;;  %6644 = vst [vmem:[#allocation4_spill] sm:$0xff] %v5732_v33  ;;  %v5735_v34 = vld [vmem:[%s5560_s26 + $0x52] sm:$0xff]  ;;  %6645 = vst [vmem:[#allocation5_spill] sm:$0xff] %v5738_v35  ;;  %v5741_v36 = vld [vmem:[%s5560_s26 + $0x62] sm:$0xff] }
  0x1f   : > { %4789 = vmatprep.mubr.msk.f32.mxu1 %vm239_vm1, %v5590_v12  ;;  %4989 = vmatprep.mubr.msk.f32.mxu0 %vm239_vm1, %v5606_v14  ;;  %6646 = vst [vmem:[#allocation6_spill] sm:$0xff] %v5752_v37  ;;  %v5755_v38 = vld [vmem:[%s5560_s26 + $0x6a] sm:$0xff]  ;;  %v5758_v39 = vld [vmem:[%s5560_s26 + $0x121] sm:$0xff]  ;;  %v5778_v43 = vld [vmem:[%s5560_s26 + $0x139] sm:$0xff] }
  0x20   : > { %6647 = vst [vmem:[#allocation7_spill] sm:$0xff] %v5758_v39  ;;  %v5761_v40 = vld [vmem:[%s5560_s26 + $0x7a] sm:$0xff]  ;;  %v5772_v41 = vld [vmem:[%s5560_s26 + $0x129] sm:$0xff]  ;;  %6649 = vst [vmem:[#allocation9_spill] sm:$0xff] %v5778_v43 }
  0x21   : > { %6648 = vst [vmem:[#allocation8_spill] sm:$0xff] %v5772_v41  ;;  %v5775_v42 = vld [vmem:[%s5560_s26 + $0x82] sm:$0xff]  ;;  %v5781_v44 = vld [vmem:[%s5560_s26 + $0x92] sm:$0xff]  ;;  %v5795_v46 = vld [vmem:[%s5560_s26 + $0x9a] sm:$0xff] }
  0x22   : > { %4790 = vmatmul.mubr.msk.f32.gmra.mrb[6].mxu1 %vm239_vm1, %v5603_v13  ;;  %4990 = vmatmul.mubr.msk.f32.gmra.mrb[6].mxu0 %vm239_vm1, %v5617_v15  ;;  %v5792_v45 = vld [vmem:[%s5560_s26 + $0x141] sm:$0xff]  ;;  %v5798_v47 = vld [vmem:[%s5560_s26 + $0x151] sm:$0xff]  ;;  %v5812_v49 = vld [vmem:[%s5560_s26 + $0x159] sm:$0xff] }
  0x23   : > { %4792 = vmatprep.mubr.msk.f32.mxu1 %vm239_vm1, %v5606_v14  ;;  %4992 = vmatprep.mubr.msk.f32.mxu0 %vm239_vm1, %v5620_v16  ;;  %6650 = vst [vmem:[#allocation10_spill] sm:$0xff] %v5792_v45  ;;  %6651 = vst [vmem:[#allocation11_spill] sm:$0xff] %v5798_v47  ;;  %v5801_v48 = vld [vmem:[%s5560_s26 + $0xaa] sm:$0xff]  ;;  %v5815_v50 = vld [vmem:[%s5560_s26 + $0xb2] sm:$0xff] }
  0x24   : > { %6652 = vst [vmem:[#allocation12_spill] sm:$0xff] %v5812_v49  ;;  %v5818_v51 = vld [vmem:[%s5560_s26 + $0x169] sm:$0xff]  ;;  %v5832_v53 = vld [vmem:[%s5560_s26 + $0x171] sm:$0xff]  ;;  %v172_v55 = vld [vmem:[%s5560_s26] sm:$0xff] }
  0x25   : > { %6653 = vst [vmem:[#allocation13_spill] sm:$0xff] %v5818_v51  ;;  %v5821_v52 = vld [vmem:[%s5560_s26 + $0xc2] sm:$0xff]  ;;  %6654 = vst [vmem:[#allocation14_spill] sm:$0xff] %v5832_v53  ;;  %v5835_v54 = vld [vmem:[%s5560_s26 + $0xca] sm:$0xff] }
  0x26   : > { %4793 = vmatmul.mubr.msk.f32.gmra.mrb[8].mxu1 %vm239_vm1, %v5617_v15  ;;  %4993 = vmatmul.mubr.msk.f32.gmra.mrb[8].mxu0 %vm239_vm1, %v5631_v17  ;;  %v5839_v56 = vld [vmem:[%s5560_s26 + $0xda] sm:$0xff]  ;;  %v173_v57 = vld [vmem:[%s5560_s26 + $0x8] sm:$0xff]  ;;  %v5856_v60 = vld [vmem:[%s5560_s26 + $0xf2] sm:$0xff] }
  0x27   : > { %4795 = vmatprep.mubr.msk.f32.mxu1 %vm239_vm1, %v5620_v16  ;;  %4995 = vmatprep.mubr.msk.f32.mxu0 %vm239_vm1, %v5634_v18  ;;  %v5850_v58 = vld [vmem:[%s5560_s26 + $0xe2] sm:$0xff]  ;;  %v5853_v59 = vld [vmem:[%s5560_s26 + $0x18] sm:$0xff]  ;;  %v5879_v0 = vld [vmem:[%s5560_s26 + $0x30] sm:$0xff] }
  0x28   : > { %6655 = vst [vmem:[#allocation15_spill] sm:$0xff] %v5853_v59  ;;  %v5871_v62 = vld [vmem:[%s5560_s26 + $0x20] sm:$0xff]  ;;  %6657 = vst [vmem:[#allocation17_spill] sm:$0xff] %v5879_v0  ;;  %v5882_v2 = vld [vmem:[%s5560_s26 + $0x10a] sm:$0xff] }
  0x29   : > { %6656 = vst [vmem:[#allocation16_spill] sm:$0xff] %v5871_v62  ;;  %v5874_v63 = vld [vmem:[%s5560_s26 + $0xfa] sm:$0xff]  ;;  %v5898_v4 = vld [vmem:[%s5560_s26 + $0x112] sm:$0xff]  ;;  %v5901_v5 = vld [vmem:[%s5560_s26 + $0x48] sm:$0xff] }
  0x2a   : > { %4796 = vmatmul.mubr.msk.f32.gmra.mrb[10].mxu1 %vm239_vm1, %v5631_v17  ;;  %4996 = vmatmul.mubr.msk.f32.gmra.mrb[10].mxu0 %vm239_vm1, %v5645_v19  ;;  %v5895_v3 = vld [vmem:[%s5560_s26 + $0x38] sm:$0xff]  ;;  %6659 = vst [vmem:[#allocation19_spill] sm:$0xff] %v5901_v5  ;;  %v5904_v6 = vld [vmem:[%s5560_s26 + $0x122] sm:$0xff]  ;;  %v5915_v7 = vld [vmem:[%s5560_s26 + $0x50] sm:$0xff] }
  0x2b   : > { %4798 = vmatprep.mubr.msk.f32.mxu1 %vm239_vm1, %v5634_v18  ;;  %4998 = vmatprep.mubr.msk.f32.mxu0 %vm239_vm1, %v5648_v20  ;;  %6658 = vst [vmem:[#allocation18_spill] sm:$0xff] %v5895_v3  ;;  %6660 = vst [vmem:[#allocation20_spill] sm:$0xff] %v5915_v7 }
  0x2e   : > { %4799 = vmatmul.mubr.msk.f32.gmra.mrb[12].mxu1 %vm239_vm1, %v5645_v19  ;;  %4999 = vmatmul.mubr.msk.f32.gmra.mrb[12].mxu0 %vm239_vm1, %v5659_v21 }
  0x2f   : > { %4801 = vmatprep.mubr.msk.f32.mxu1 %vm239_vm1, %v5648_v20  ;;  %5001 = vmatprep.mubr.msk.f32.mxu0 %vm239_vm1, %v5662_v22 }
  0x32   : > { %4802 = vmatmul.mubr.msk.f32.gmra.mrb[14].mxu1 %vm239_vm1, %v5659_v21  ;;  %5002 = vmatmul.mubr.msk.f32.gmra.mrb[14].mxu0 %vm239_vm1, %v5673_v23 }
  0x33   : > { %4804 = vmatprep.mubr.msk.f32.mxu1 %vm239_vm1, %v5662_v22  ;;  %5030 = vmatprep.mubr.msk.f32.mxu0 %vm239_vm1, %v5676_v24 }
  0x36   : > { %4805 = vmatmul.mubr.msk.f32.gmra.mrb[16].mxu1 %vm239_vm1, %v5673_v23  ;;  %5031 = vmatmul.mubr.msk.f32.vlgmr.msra.gmra.mrb[0].mxu0 %vm239_vm1, %v5687_v25 }
  0x37   : > { %5079 = vmatpush3.msk.msra.mxu0 %vm336_vm0, %v4248_v9  ;;  %4807 = vmatprep.mubr.msk.f32.mxu1 %vm239_vm1, %v5690_v26  ;;  %v5918_v9 = vld [vmem:[%s5560_s26 + $0x12a] sm:$0xff] }
  0x38   : > { %5033 = vmatprep.mubr.msk.f32.mxu0 %vm239_vm1, %v5693_v27  ;;  %5128 = vmatprep.subr.msk.mxu0 %vm336_vm0, %v5698_v28 }
  0x3a   : > { %4808 = vmatmul.mubr.msk.f32.gmra.mrb[18].mxu1 %vm239_vm1, %v5708_v29  ;;  %5034 = vmatmul.mubr.msk.f32.gmra.mrb[2].mxu0 %vm239_vm1, %v5711_v30  ;;  %v6015_v29 = vld [vmem:[%s5560_s26 + $0xd8] sm:$0xff] }
  0x3b   : > { %4810 = vmatprep.mubr.msk.f32.mxu1 %vm239_vm1, %v5716_v31  ;;  %5036 = vmatprep.mubr.msk.f32.mxu0 %vm239_vm1, %v5719_v32  ;;  %v5998_v31 = vld [vmem:[%s5560_s26 + $0x18a] sm:$0xff] }
  0x3c   : > { %6671 = vst [vmem:[#allocation31_spill] sm:$0xff] %v5998_v31 }
  0x3e   : > { %4811 = vmatmul.mubr.msk.f32.gmra.mrb[20].mxu1 %vm239_vm1, %v5732_v33  ;;  %5037 = vmatmul.mubr.msk.f32.gmra.mrb[4].mxu0 %vm239_vm1, %v5735_v34  ;;  %v5984_v33 = vld [vmem:[%s5560_s26 + $0x182] sm:$0xff] }
  0x3f   : > { %4813 = vmatprep.mubr.msk.f32.mxu1 %vm239_vm1, %v5738_v35  ;;  %5039 = vmatprep.mubr.msk.f32.mxu0 %vm239_vm1, %v5741_v36  ;;  %v5981_v35 = vld [vmem:[%s5560_s26 + $0xa8] sm:$0xff]  ;;  %6669 = vst [vmem:[#allocation29_spill] sm:$0xff] %v5984_v33 }
  0x40   : > { %6668 = vst [vmem:[#allocation28_spill] sm:$0xff] %v5981_v35 }
  0x42   : > { %4814 = vmatmul.mubr.msk.f32.gmra.mrb[22].mxu1 %vm239_vm1, %v5752_v37  ;;  %5040 = vmatmul.mubr.msk.f32.gmra.mrb[6].mxu0 %vm239_vm1, %v5755_v38  ;;  %v5978_v37 = vld [vmem:[%s5560_s26 + $0x172] sm:$0xff] }
  0x43   : > { %4816 = vmatprep.mubr.msk.f32.mxu1 %vm239_vm1, %v5758_v39  ;;  %5042 = vmatprep.mubr.msk.f32.mxu0 %vm239_vm1, %v5761_v40  ;;  %v5975_v39 = vld [vmem:[%s5560_s26 + $0x98] sm:$0xff]  ;;  %6667 = vst [vmem:[#allocation27_spill] sm:$0xff] %v5978_v37 }
  0x44   : > { %6666 = vst [vmem:[#allocation26_spill] sm:$0xff] %v5975_v39 }
  0x46   : > { %4817 = vmatmul.mubr.msk.f32.gmra.mrb[24].mxu1 %vm239_vm1, %v5772_v41  ;;  %5043 = vmatmul.mubr.msk.f32.gmra.mrb[8].mxu0 %vm239_vm1, %v5775_v42  ;;  %v5964_v41 = vld [vmem:[%s5560_s26 + $0x16a] sm:$0xff] }
  0x47   : > { %4819 = vmatprep.mubr.msk.f32.mxu1 %vm239_vm1, %v5778_v43  ;;  %5045 = vmatprep.mubr.msk.f32.mxu0 %vm239_vm1, %v5781_v44  ;;  %v5961_v43 = vld [vmem:[%s5560_s26 + $0x90] sm:$0xff] }
  0x48   : > { %6665 = vst [vmem:[#allocation25_spill] sm:$0xff] %v5961_v43 }
  0x4a   : > { %4820 = vmatmul.mubr.msk.f32.gmra.mrb[26].mxu1 %vm239_vm1, %v5792_v45  ;;  %5046 = vmatmul.mubr.msk.f32.gmra.mrb[10].mxu0 %vm239_vm1, %v5795_v46  ;;  %v5958_v45 = vld [vmem:[%s5560_s26 + $0x15a] sm:$0xff] }
  0x4b   : > { %4822 = vmatprep.mubr.msk.f32.mxu1 %vm239_vm1, %v5798_v47  ;;  %5048 = vmatprep.mubr.msk.f32.mxu0 %vm239_vm1, %v5801_v48  ;;  %v5955_v47 = vld [vmem:[%s5560_s26 + $0x80] sm:$0xff] }
  0x4c   : > { %6664 = vst [vmem:[#allocation24_spill] sm:$0xff] %v5955_v47 }
  0x4e   : > { %4823 = vmatmul.mubr.msk.f32.gmra.mrb[28].mxu1 %vm239_vm1, %v5812_v49  ;;  %5049 = vmatmul.mubr.msk.f32.gmra.mrb[12].mxu0 %vm239_vm1, %v5815_v50  ;;  %v5944_v49 = vld [vmem:[%s5560_s26 + $0x152] sm:$0xff] }
  0x4f   : > { %4825 = vmatprep.mubr.msk.f32.mxu1 %vm239_vm1, %v5818_v51  ;;  %5051 = vmatprep.mubr.msk.f32.mxu0 %vm239_vm1, %v5821_v52  ;;  %v5941_v51 = vld [vmem:[%s5560_s26 + $0x78] sm:$0xff] }
  0x50   : > { %6663 = vst [vmem:[#allocation23_spill] sm:$0xff] %v5941_v51 }
  0x52   : > { %4826 = vmatmul.mubr.msk.f32.gmra.mrb[30].mxu1 %vm239_vm1, %v5832_v53  ;;  %5052 = vmatmul.mubr.msk.f32.gmra.mrb[14].mxu0 %vm239_vm1, %v5835_v54  ;;  %v5938_v53 = vld [vmem:[%s5560_s26 + $0x142] sm:$0xff] }
  0x53   : > { %4830 = vmatprep.mubr.msk.f32.mxu1 %vm239_vm1, %v172_v55  ;;  %5054 = vmatprep.mubr.msk.f32.mxu0 %vm239_vm1, %v5839_v56  ;;  %v5924_v55 = vld [vmem:[%s5560_s26 + $0x13a] sm:$0xff] }
  0x56   : > { %4831 = vmatmul.mubr.msk.f32.vlgmr.msra.gmra.mrb[0].mxu1 %vm239_vm1, %v173_v57  ;;  %5055 = vmatmul.mubr.msk.f32.gmra.mrb[16].mxu0 %vm239_vm1, %v5850_v58  ;;  %v5935_v57 = vld [vmem:[%s5560_s26 + $0x68] sm:$0xff] }
  0x57   : > { %4879 = vmatpush3.msk.msra.mxu1 %vm336_vm0, %v5579_v10  ;;  %4833 = vmatprep.mubr.msk.f32.mxu1 %vm239_vm1, %v5853_v59  ;;  %v5921_v10 = vld [vmem:[%s5560_s26 + $0x60] sm:$0xff]  ;;  %6662 = vst [vmem:[#allocation22_spill] sm:$0xff] %v5935_v57 }
  0x58   : > { %5057 = vmatprep.mubr.msk.f32.mxu0 %vm239_vm1, %v5856_v60  ;;  %4928 = vmatprep.subr.msk.mxu1 %vm336_vm0, %v5861_v61  ;;  %6661 = vst [vmem:[#allocation21_spill] sm:$0xff] %v5921_v10  ;;  %v6001_v59 = vld [vmem:[%s5560_s26 + $0xc0] sm:$0xff] }
  0x5a   : > { %4834 = vmatmul.mubr.msk.f32.gmra.mrb[2].mxu1 %vm239_vm1, %v5871_v62  ;;  %5058 = vmatmul.mubr.msk.f32.gmra.mrb[18].mxu0 %vm239_vm1, %v5874_v63  ;;  %v5995_v62 = vld [vmem:[%s5560_s26 + $0xb0] sm:$0xff] }
  0x5b   : > { %4836 = vmatprep.mubr.msk.f32.mxu1 %vm239_vm1, %v5879_v0  ;;  %5060 = vmatprep.mubr.msk.f32.mxu0 %vm239_vm1, %v5882_v2  ;;  %6670 = vst [vmem:[#allocation30_spill] sm:$0xff] %v5995_v62 }
  0x5e   : > { %4837 = vmatmul.mubr.msk.f32.gmra.mrb[4].mxu1 %vm239_vm1, %v5895_v3  ;;  %5061 = vmatmul.mubr.msk.f32.gmra.mrb[20].mxu0 %vm239_vm1, %v5898_v4 }
  0x5f   : > { %4839 = vmatprep.mubr.msk.f32.mxu1 %vm239_vm1, %v5901_v5  ;;  %5063 = vmatprep.mubr.msk.f32.mxu0 %vm239_vm1, %v5904_v6 }
  0x62   : > { %4840 = vmatmul.mubr.msk.f32.gmra.mrb[6].mxu1 %vm239_vm1, %v5915_v7  ;;  %5064 = vmatmul.mubr.msk.f32.gmra.mrb[22].mxu0 %vm239_vm1, %v5918_v9 }
  0x63   : > { %4842 = vmatprep.mubr.msk.f32.mxu1 %vm239_vm1, %v5921_v10  ;;  %5066 = vmatprep.mubr.msk.f32.mxu0 %vm239_vm1, %v5924_v55 }
  0x66   : > { %4843 = vmatmul.mubr.msk.f32.gmra.mrb[8].mxu1 %vm239_vm1, %v5935_v57  ;;  %5067 = vmatmul.mubr.msk.f32.gmra.mrb[24].mxu0 %vm239_vm1, %v5938_v53 }
  0x67   : > { %4845 = vmatprep.mubr.msk.f32.mxu1 %vm239_vm1, %v5941_v51  ;;  %5069 = vmatprep.mubr.msk.f32.mxu0 %vm239_vm1, %v5944_v49 }
  0x6a   : > { %4846 = vmatmul.mubr.msk.f32.gmra.mrb[10].mxu1 %vm239_vm1, %v5955_v47  ;;  %5070 = vmatmul.mubr.msk.f32.gmra.mrb[26].mxu0 %vm239_vm1, %v5958_v45 }
  0x6b   : > { %4848 = vmatprep.mubr.msk.f32.mxu1 %vm239_vm1, %v5961_v43  ;;  %5072 = vmatprep.mubr.msk.f32.mxu0 %vm239_vm1, %v5964_v41 }
  0x6e   : > { %4849 = vmatmul.mubr.msk.f32.gmra.mrb[12].mxu1 %vm239_vm1, %v5975_v39  ;;  %5073 = vmatmul.mubr.msk.f32.gmra.mrb[28].mxu0 %vm239_vm1, %v5978_v37  ;;  %v6020_v37 = vld [vmem:[%s6594_s1 + $0x20] sm:$0x7] }
  0x6f   : > { %4851 = vmatprep.mubr.msk.f32.mxu1 %vm239_vm1, %v5981_v35  ;;  %5075 = vmatprep.mubr.msk.f32.mxu0 %vm239_vm1, %v5984_v33  ;;  %v6012_v33 = vld [vmem:[%s5560_s26 + $0xc8] sm:$0xff] }
  0x70   : > { %6672 = vst [vmem:[#allocation32_spill] sm:$0xff] %v6012_v33 }
  0x72   : > { %4852 = vmatmul.mubr.msk.f32.gmra.mrb[14].mxu1 %vm239_vm1, %v5995_v62  ;;  %5076 = vmatmul.mubr.msk.f32.gmra.mrb[30].mxu0 %vm239_vm1, %v5998_v31  ;;  %v6031_v31 = vld [vmem:[%s5560_s26 + $0xe0] sm:$0xff] }
  0x73   : > { %4854 = vmatprep.mubr.msk.f32.mxu1 %vm239_vm1, %v6001_v59  ;;  %5080 = vmatprep.mubr.msk.f32.mxu0 %vm239_vm1, %v5879_v0  ;;  %v6036_v0 = vld [vmem:[%s5560_s26 + $0xf0] sm:$0xff] }
  0x76   : > { %4855 = vmatmul.mubr.msk.f32.gmra.mrb[16].mxu1 %vm239_vm1, %v6012_v33  ;;  %5081 = vmatmul.mubr.msk.f32.vlgmr.msra.gmra.mrb[0].mxu0 %vm239_vm1, %v5895_v3  ;;  %v889_v3 = vld [vmem:[%s5560_s26 + $0x2] sm:$0xff] }
  0x77   : > { %5129 = vmatpush3.msk.msra.mxu0 %vm336_vm0, %v5698_v28  ;;  %4857 = vmatprep.mubr.msk.f32.mxu1 %vm239_vm1, %v6015_v29  ;;  %v6049_v28 = vld [vmem:[%s5560_s26 + $0xf8] sm:$0xff] }
  0x78   : > { %5083 = vmatprep.mubr.msk.f32.mxu0 %vm239_vm1, %v5901_v5  ;;  %5178 = vmatprep.subr.msk.mxu0 %vm336_vm0, %v6020_v37  ;;  %v6052_v5 = vld [vmem:[%s5560_s26 + $0x108] sm:$0xff] }
  0x7a   : > { %4858 = vmatmul.mubr.msk.f32.gmra.mrb[18].mxu1 %vm239_vm1, %v6031_v31  ;;  %5084 = vmatmul.mubr.msk.f32.gmra.mrb[2].mxu0 %vm239_vm1, %v5915_v7  ;;  %v6063_v7 = vld [vmem:[%s5560_s26 + $0x110] sm:$0xff] }
  0x7b   : > { %4860 = vmatprep.mubr.msk.f32.mxu1 %vm239_vm1, %v6036_v0  ;;  %5086 = vmatprep.mubr.msk.f32.mxu0 %vm239_vm1, %v5921_v10  ;;  %v6066_v10 = vld [vmem:[%s5560_s26 + $0x120] sm:$0xff] }
  0x7e   : > { %4861 = vmatmul.mubr.msk.f32.gmra.mrb[20].mxu1 %vm239_vm1, %v6049_v28  ;;  %5087 = vmatmul.mubr.msk.f32.gmra.mrb[4].mxu0 %vm239_vm1, %v5935_v57  ;;  %v6077_v57 = vld [vmem:[%s5560_s26 + $0x128] sm:$0xff] }
  0x7f   : > { %4863 = vmatprep.mubr.msk.f32.mxu1 %vm239_vm1, %v6052_v5  ;;  %5089 = vmatprep.mubr.msk.f32.mxu0 %vm239_vm1, %v5941_v51  ;;  %v6080_v51 = vld [vmem:[%s5560_s26 + $0x138] sm:$0xff] }
  0x82   : > { %4864 = vmatmul.mubr.msk.f32.gmra.mrb[22].mxu1 %vm239_vm1, %v6063_v7  ;;  %5090 = vmatmul.mubr.msk.f32.gmra.mrb[6].mxu0 %vm239_vm1, %v5955_v47  ;;  %v6091_v47 = vld [vmem:[%s5560_s26 + $0x140] sm:$0xff] }
  0x83   : > { %4866 = vmatprep.mubr.msk.f32.mxu1 %vm239_vm1, %v6066_v10  ;;  %5092 = vmatprep.mubr.msk.f32.mxu0 %vm239_vm1, %v5961_v43  ;;  %v6094_v43 = vld [vmem:[%s5560_s26 + $0x150] sm:$0xff] }
  0x86   : > { %4867 = vmatmul.mubr.msk.f32.gmra.mrb[24].mxu1 %vm239_vm1, %v6077_v57  ;;  %5093 = vmatmul.mubr.msk.f32.gmra.mrb[8].mxu0 %vm239_vm1, %v5975_v39  ;;  %v6105_v39 = vld [vmem:[%s5560_s26 + $0x158] sm:$0xff] }
  0x87   : > { %4869 = vmatprep.mubr.msk.f32.mxu1 %vm239_vm1, %v6080_v51  ;;  %5095 = vmatprep.mubr.msk.f32.mxu0 %vm239_vm1, %v5981_v35  ;;  %v6108_v35 = vld [vmem:[%s5560_s26 + $0x168] sm:$0xff] }
  0x8a   : > { %4870 = vmatmul.mubr.msk.f32.gmra.mrb[26].mxu1 %vm239_vm1, %v6091_v47  ;;  %5096 = vmatmul.mubr.msk.f32.gmra.mrb[10].mxu0 %vm239_vm1, %v5995_v62  ;;  %v6119_v62 = vld [vmem:[%s5560_s26 + $0x170] sm:$0xff] }
  0x8b   : > { %4872 = vmatprep.mubr.msk.f32.mxu1 %vm239_vm1, %v6094_v43  ;;  %5098 = vmatprep.mubr.msk.f32.mxu0 %vm239_vm1, %v6001_v59 }
  0x8e   : > { %4873 = vmatmul.mubr.msk.f32.gmra.mrb[28].mxu1 %vm239_vm1, %v6105_v39  ;;  %5099 = vmatmul.mubr.msk.f32.gmra.mrb[12].mxu0 %vm239_vm1, %v6012_v33  ;;  %v890_v33 = vld [vmem:[%s5560_s26 + $0xa] sm:$0xff] }
  0x8f   : > { %4875 = vmatprep.mubr.msk.f32.mxu1 %vm239_vm1, %v6108_v35  ;;  %5101 = vmatprep.mubr.msk.f32.mxu0 %vm239_vm1, %v6015_v29 }
  0x92   : > { %4876 = vmatmul.mubr.msk.f32.gmra.mrb[30].mxu1 %vm239_vm1, %v6119_v62  ;;  %5102 = vmatmul.mubr.msk.f32.gmra.mrb[14].mxu0 %vm239_vm1, %v6031_v31 }
  0x93   : > { %4880 = vmatprep.mubr.msk.f32.mxu1 %vm239_vm1, %v889_v3  ;;  %5104 = vmatprep.mubr.msk.f32.mxu0 %vm239_vm1, %v6036_v0  ;;  %v6689_v3 = vld [vmem:[#allocation22_spill] sm:$0xff] }
  0x96   : > { %4881 = vmatmul.mubr.msk.f32.vlgmr.msra.gmra.mrb[0].mxu1 %vm239_vm1, %v890_v33  ;;  %5105 = vmatmul.mubr.msk.f32.gmra.mrb[16].mxu0 %vm239_vm1, %v6049_v28  ;;  %v4246_v33 = vld [vmem:[%s5560_s26 + $0x198] sm:$0xff] }
  0x97   : > { %4929 = vmatpush3.msk.msra.mxu1 %vm336_vm0, %v5861_v61  ;;  %4883 = vmatprep.mubr.msk.f32.mxu1 %vm239_vm1, %v5676_v24  ;;  %v6174_v24 = vld [vmem:[%s5560_s26 + $0x180] sm:$0xff] }
  0x98   : > { %5107 = vmatprep.mubr.msk.f32.mxu0 %vm239_vm1, %v6052_v5  ;;  %5228 = vmatprep.subr.msk.mxu1 %vm336_vm0, %v5539_v1  ;;  %v4247_v61 = vld [vmem:[%s5560_s26 + $0x1a0] sm:$0xff] }
  0x9a   : > { %4884 = vmatmul.mubr.msk.f32.gmra.mrb[2].mxu1 %vm239_vm1, %v5687_v25  ;;  %5108 = vmatmul.mubr.msk.f32.gmra.mrb[18].mxu0 %vm239_vm1, %v6063_v7  ;;  %v6185_v25 = vld [vmem:[%s5560_s26 + $0x188] sm:$0xff] }
  0x9b   : > { %4886 = vmatprep.mubr.msk.f32.mxu1 %vm239_vm1, %v5693_v27  ;;  %5110 = vmatprep.mubr.msk.f32.mxu0 %vm239_vm1, %v6066_v10 }
  0x9e   : > { %4887 = vmatmul.mubr.msk.f32.gmra.mrb[4].mxu1 %vm239_vm1, %v5711_v30  ;;  %5111 = vmatmul.mubr.msk.f32.gmra.mrb[20].mxu0 %vm239_vm1, %v6077_v57 }
  0x9f   : > { %4889 = vmatprep.mubr.msk.f32.mxu1 %vm239_vm1, %v5719_v32  ;;  %5113 = vmatprep.mubr.msk.f32.mxu0 %vm239_vm1, %v6080_v51 }
  0xa2   : > { %4890 = vmatmul.mubr.msk.f32.gmra.mrb[6].mxu1 %vm239_vm1, %v5735_v34  ;;  %5114 = vmatmul.mubr.msk.f32.gmra.mrb[22].mxu0 %vm239_vm1, %v6091_v47 }
  0xa3   : > { %4892 = vmatprep.mubr.msk.f32.mxu1 %vm239_vm1, %v5741_v36  ;;  %5116 = vmatprep.mubr.msk.f32.mxu0 %vm239_vm1, %v6094_v43 }
  0xa6   : > { %4893 = vmatmul.mubr.msk.f32.gmra.mrb[8].mxu1 %vm239_vm1, %v5755_v38  ;;  %5117 = vmatmul.mubr.msk.f32.gmra.mrb[24].mxu0 %vm239_vm1, %v6105_v39 }
  0xa7   : > { %4895 = vmatprep.mubr.msk.f32.mxu1 %vm239_vm1, %v5761_v40  ;;  %5119 = vmatprep.mubr.msk.f32.mxu0 %vm239_vm1, %v6108_v35 }
  0xaa   : > { %4896 = vmatmul.mubr.msk.f32.gmra.mrb[10].mxu1 %vm239_vm1, %v5775_v42  ;;  %5120 = vmatmul.mubr.msk.f32.gmra.mrb[26].mxu0 %vm239_vm1, %v6119_v62 }
  0xab   : > { %4898 = vmatprep.mubr.msk.f32.mxu1 %vm239_vm1, %v5781_v44  ;;  %5122 = vmatprep.mubr.msk.f32.mxu0 %vm239_vm1, %v6174_v24 }
  0xae   : > { %4899 = vmatmul.mubr.msk.f32.gmra.mrb[12].mxu1 %vm239_vm1, %v5795_v46  ;;  %5123 = vmatmul.mubr.msk.f32.gmra.mrb[28].mxu0 %vm239_vm1, %v6185_v25 }
  0xaf   : > { %4901 = vmatprep.mubr.msk.f32.mxu1 %vm239_vm1, %v5801_v48  ;;  %5125 = vmatprep.mubr.msk.f32.mxu0 %vm239_vm1, %v4246_v33  ;;  %v6690_v33 = vld [vmem:[#allocation10_spill] sm:$0xff] }
  0xb2   : > { %4902 = vmatmul.mubr.msk.f32.gmra.mrb[14].mxu1 %vm239_vm1, %v5815_v50  ;;  %5126 = vmatmul.mubr.msk.f32.gmra.mrb[30].mxu0 %vm239_vm1, %v4247_v61  ;;  %v6691_v61 = vld [vmem:[#allocation23_spill] sm:$0xff] }
  0xb3   : > { %4904 = vmatprep.mubr.msk.f32.mxu1 %vm239_vm1, %v5821_v52  ;;  %5130 = vmatprep.mubr.msk.f32.mxu0 %vm239_vm1, %v5569_v8  ;;  %v6673_v8 = vld [vmem:[#allocation27_spill] sm:$0xff] }
  0xb6   : > { %4905 = vmatmul.mubr.msk.f32.gmra.mrb[16].mxu1 %vm239_vm1, %v5835_v54  ;;  %5131 = vmatmul.mubr.msk.f32.vlgmr.msra.gmra.mrb[0].mxu0 %vm239_vm1, %v5584_v11  ;;  %v6674_v11 = vld [vmem:[#allocation2_spill] sm:$0xff] }
  0xb7   : > { %5179 = vmatpush3.msk.msra.mxu0 %vm336_vm0, %v6020_v37  ;;  %4907 = vmatprep.mubr.msk.f32.mxu1 %vm239_vm1, %v5839_v56  ;;  %v6688_v37 = vld [vmem:[#allocation9_spill] sm:$0xff] }
  0xb8   : > { %5133 = vmatprep.mubr.msk.f32.mxu0 %vm239_vm1, %v5590_v12  ;;  %v6675_v12 = vld [vmem:[#allocation15_spill] sm:$0xff] }
  0xba   : > { %4908 = vmatmul.mubr.msk.f32.gmra.mrb[18].mxu1 %vm239_vm1, %v5850_v58  ;;  %5134 = vmatmul.mubr.msk.f32.gmra.mrb[2].mxu0 %vm239_vm1, %v5603_v13  ;;  %v6676_v13 = vld [vmem:[#allocation3_spill] sm:$0xff] }
  0xbb   : > { %4910 = vmatprep.mubr.msk.f32.mxu1 %vm239_vm1, %v5856_v60  ;;  %5136 = vmatprep.mubr.msk.f32.mxu0 %vm239_vm1, %v5606_v14  ;;  %v6677_v14 = vld [vmem:[#allocation16_spill] sm:$0xff] }
  0xbe   : > { %4911 = vmatmul.mubr.msk.f32.gmra.mrb[20].mxu1 %vm239_vm1, %v5874_v63  ;;  %5137 = vmatmul.mubr.msk.f32.gmra.mrb[4].mxu0 %vm239_vm1, %v5617_v15  ;;  %v6678_v15 = vld [vmem:[#allocation4_spill] sm:$0xff] }
  0xbf   : > { %4913 = vmatprep.mubr.msk.f32.mxu1 %vm239_vm1, %v5882_v2  ;;  %5139 = vmatprep.mubr.msk.f32.mxu0 %vm239_vm1, %v5620_v16  ;;  %v6679_v16 = vld [vmem:[#allocation17_spill] sm:$0xff] }
  0xc2   : > { %4914 = vmatmul.mubr.msk.f32.gmra.mrb[22].mxu1 %vm239_vm1, %v5898_v4  ;;  %5140 = vmatmul.mubr.msk.f32.gmra.mrb[6].mxu0 %vm239_vm1, %v5631_v17  ;;  %v6680_v17 = vld [vmem:[#allocation5_spill] sm:$0xff] }
  0xc3   : > { %4916 = vmatprep.mubr.msk.f32.mxu1 %vm239_vm1, %v5904_v6  ;;  %5142 = vmatprep.mubr.msk.f32.mxu0 %vm239_vm1, %v5634_v18  ;;  %v6681_v18 = vld [vmem:[#allocation18_spill] sm:$0xff] }
  0xc6   : > { %4917 = vmatmul.mubr.msk.f32.gmra.mrb[24].mxu1 %vm239_vm1, %v5918_v9  ;;  %5143 = vmatmul.mubr.msk.f32.gmra.mrb[8].mxu0 %vm239_vm1, %v5645_v19  ;;  %v6682_v19 = vld [vmem:[#allocation6_spill] sm:$0xff] }
  0xc7   : > { %4919 = vmatprep.mubr.msk.f32.mxu1 %vm239_vm1, %v5924_v55  ;;  %5145 = vmatprep.mubr.msk.f32.mxu0 %vm239_vm1, %v5648_v20  ;;  %v6683_v20 = vld [vmem:[#allocation19_spill] sm:$0xff] }
  0xca   : > { %4920 = vmatmul.mubr.msk.f32.gmra.mrb[26].mxu1 %vm239_vm1, %v5938_v53  ;;  %5146 = vmatmul.mubr.msk.f32.gmra.mrb[10].mxu0 %vm239_vm1, %v5659_v21  ;;  %v6684_v21 = vld [vmem:[#allocation7_spill] sm:$0xff] }
  0xcb   : > { %4922 = vmatprep.mubr.msk.f32.mxu1 %vm239_vm1, %v5944_v49  ;;  %5148 = vmatprep.mubr.msk.f32.mxu0 %vm239_vm1, %v5662_v22  ;;  %v6686_v22 = vld [vmem:[#allocation8_spill] sm:$0xff] }
  0xce   : > { %4923 = vmatmul.mubr.msk.f32.gmra.mrb[28].mxu1 %vm239_vm1, %v5958_v45  ;;  %5149 = vmatmul.mubr.msk.f32.gmra.mrb[12].mxu0 %vm239_vm1, %v5673_v23  ;;  %v6687_v23 = vld [vmem:[#allocation21_spill] sm:$0xff] }
  0xcf   : > { %4925 = vmatprep.mubr.msk.f32.mxu1 %vm239_vm1, %v5964_v41  ;;  %5151 = vmatprep.mubr.msk.f32.mxu0 %vm239_vm1, %v5690_v26 }
  0xd2   : > { %4926 = vmatmul.mubr.msk.f32.gmra.mrb[30].mxu1 %vm239_vm1, %v6673_v8  ;;  %5152 = vmatmul.mubr.msk.f32.gmra.mrb[14].mxu0 %vm239_vm1, %v6674_v11  ;;  %v6700_v8 = vld [vmem:[#allocation30_spill] sm:$0xff] }
  0xd3   : > { %4930 = vmatprep.mubr.msk.f32.mxu1 %vm239_vm1, %v6675_v12  ;;  %5154 = vmatprep.mubr.msk.f32.mxu0 %vm239_vm1, %v6676_v13  ;;  %v6692_v12 = vld [vmem:[#allocation11_spill] sm:$0xff] }
  0xd6   : > { %4931 = vmatmul.mubr.msk.f32.vlgmr.msra.gmra.mrb[0].mxu1 %vm239_vm1, %v6677_v14  ;;  %5155 = vmatmul.mubr.msk.f32.gmra.mrb[16].mxu0 %vm239_vm1, %v6678_v15  ;;  %v6693_v14 = vld [vmem:[#allocation24_spill] sm:$0xff] }
  0xd7   : > { %5229 = vmatpush3.msk.msra.mxu1 %vm336_vm0, %v5539_v1  ;;  %4933 = vmatprep.mubr.msk.f32.mxu1 %vm239_vm1, %v6679_v16  ;;  %v6685_v1 = vld [vmem:[#allocation20_spill] sm:$0xff] }
  0xd8   : > { %5157 = vmatprep.mubr.msk.f32.mxu0 %vm239_vm1, %v6680_v17  ;;  %v6694_v16 = vld [vmem:[#allocation12_spill] sm:$0xff] }
  0xda   : > { %4934 = vmatmul.mubr.msk.f32.gmra.mrb[2].mxu1 %vm239_vm1, %v6681_v18  ;;  %5158 = vmatmul.mubr.msk.f32.gmra.mrb[18].mxu0 %vm239_vm1, %v6682_v19  ;;  %v6695_v18 = vld [vmem:[#allocation25_spill] sm:$0xff] }
  0xdb   : > { %4936 = vmatprep.mubr.msk.f32.mxu1 %vm239_vm1, %v6683_v20  ;;  %5160 = vmatprep.mubr.msk.f32.mxu0 %vm239_vm1, %v6684_v21  ;;  %v6696_v20 = vld [vmem:[#allocation13_spill] sm:$0xff] }
  0xde   : > { %4937 = vmatmul.mubr.msk.f32.gmra.mrb[4].mxu1 %vm239_vm1, %v6685_v1  ;;  %5161 = vmatmul.mubr.msk.f32.gmra.mrb[20].mxu0 %vm239_vm1, %v6686_v22  ;;  %v6312_v1 = vld [vmem:[%s5560_s26 + $0x181] sm:$0xff] }
  0xdf   : > { %4939 = vmatprep.mubr.msk.f32.mxu1 %vm239_vm1, %v6687_v23  ;;  %5163 = vmatprep.mubr.msk.f32.mxu0 %vm239_vm1, %v6688_v37  ;;  %v6697_v23 = vld [vmem:[#allocation26_spill] sm:$0xff] }
  0xe2   : > { %4940 = vmatmul.mubr.msk.f32.gmra.mrb[6].mxu1 %vm239_vm1, %v6689_v3  ;;  %5164 = vmatmul.mubr.msk.f32.gmra.mrb[22].mxu0 %vm239_vm1, %v6690_v33  ;;  %v6698_v3 = vld [vmem:[#allocation14_spill] sm:$0xff] }
  0xe3   : > { %4942 = vmatprep.mubr.msk.f32.mxu1 %vm239_vm1, %v6691_v61  ;;  %5166 = vmatprep.mubr.msk.f32.mxu0 %vm239_vm1, %v6692_v12  ;;  %v6699_v61 = vld [vmem:[#allocation28_spill] sm:$0xff] }
  0xe6   : > { %4943 = vmatmul.mubr.msk.f32.gmra.mrb[8].mxu1 %vm239_vm1, %v6693_v14  ;;  %5167 = vmatmul.mubr.msk.f32.gmra.mrb[24].mxu0 %vm239_vm1, %v6694_v16  ;;  %v6323_v14 = vld [vmem:[%s5560_s26 + $0x189] sm:$0xff] }
  0xe7   : > { %4945 = vmatprep.mubr.msk.f32.mxu1 %vm239_vm1, %v6695_v18  ;;  %5169 = vmatprep.mubr.msk.f32.mxu0 %vm239_vm1, %v6696_v20  ;;  %v4312_v18 = vld [vmem:[%s5560_s26 + $0x199] sm:$0xff] }
  0xea   : > { %4946 = vmatmul.mubr.msk.f32.gmra.mrb[10].mxu1 %vm239_vm1, %v6697_v23  ;;  %5170 = vmatmul.mubr.msk.f32.gmra.mrb[26].mxu0 %vm239_vm1, %v6698_v3  ;;  %v4313_v23 = vld [vmem:[%s5560_s26 + $0x1a1] sm:$0xff]  ;;  %v6701_v3 = vld [vmem:[#allocation32_spill] sm:$0xff] }
  0xeb   : > { %4948 = vmatprep.mubr.msk.f32.mxu1 %vm239_vm1, %v6699_v61  ;;  %5172 = vmatprep.mubr.msk.f32.mxu0 %vm239_vm1, %v6312_v1 }
  0xee   : > { %4949 = vmatmul.mubr.msk.f32.gmra.mrb[12].mxu1 %vm239_vm1, %v6700_v8  ;;  %5173 = vmatmul.mubr.msk.f32.gmra.mrb[28].mxu0 %vm239_vm1, %v6323_v14 }
  0xef   : > { %4951 = vmatprep.mubr.msk.f32.mxu1 %vm239_vm1, %v6001_v59  ;;  %5175 = vmatprep.mubr.msk.f32.mxu0 %vm239_vm1, %v4312_v18 }
  0xf2   : > { %4952 = vmatmul.mubr.msk.f32.gmra.mrb[14].mxu1 %vm239_vm1, %v6701_v3  ;;  %5176 = vmatmul.mubr.msk.f32.gmra.mrb[30].mxu0 %vm239_vm1, %v4313_v23 }
  0xf3   : > { %4954 = vmatprep.mubr.msk.f32.mxu1 %vm239_vm1, %v6015_v29  ;;  %5180 = vmatprep.mubr.msk.f32.mxu0 %vm239_vm1, %v5693_v27  ;;  %v6703_v27 = vld [vmem:[#allocation29_spill] sm:$0xff] }
  0xf4   : > { %v4378_v29 = vld [vmem:[%s5560_s26 + $0x19a] sm:$0xff] }
  0xf6   : > { %4955 = vmatmul.mubr.msk.f32.gmra.mrb[16].mxu1 %vm239_vm1, %v6031_v31  ;;  %5181 = vmatmul.mubr.msk.f32.vlgmr.msra.gmra.mrb[0].mxu0 %vm239_vm1, %v5711_v30  ;;  %v6704_v30 = vld [vmem:[#allocation14_spill] sm:$0xff]  ;;  %v6705_v31 = vld [vmem:[#allocation31_spill] sm:$0xff] }
  0xf7   : > { %4957 = vmatprep.mubr.msk.f32.mxu1 %vm239_vm1, %v6036_v0  ;;  %5183 = vmatprep.mubr.msk.f32.mxu0 %vm239_vm1, %v5719_v32  ;;  %v4379_v32 = vld [vmem:[%s5560_s26 + $0x1a2] sm:$0xff] }
  0xfa   : > { %4958 = vmatmul.mubr.msk.f32.gmra.mrb[18].mxu1 %vm239_vm1, %v6049_v28  ;;  %5184 = vmatmul.mubr.msk.f32.gmra.mrb[2].mxu0 %vm239_vm1, %v5735_v34 }
  0xfb   : > { %4960 = vmatprep.mubr.msk.f32.mxu1 %vm239_vm1, %v6052_v5  ;;  %5186 = vmatprep.mubr.msk.f32.mxu0 %vm239_vm1, %v5741_v36 }
  0xfe   : > { %4961 = vmatmul.mubr.msk.f32.gmra.mrb[20].mxu1 %vm239_vm1, %v6063_v7  ;;  %5187 = vmatmul.mubr.msk.f32.gmra.mrb[4].mxu0 %vm239_vm1, %v5755_v38 }
  0xff   : > { %4963 = vmatprep.mubr.msk.f32.mxu1 %vm239_vm1, %v6066_v10  ;;  %5189 = vmatprep.mubr.msk.f32.mxu0 %vm239_vm1, %v5761_v40 }
 0x102   : > { %4964 = vmatmul.mubr.msk.f32.gmra.mrb[22].mxu1 %vm239_vm1, %v6077_v57  ;;  %5190 = vmatmul.mubr.msk.f32.gmra.mrb[6].mxu0 %vm239_vm1, %v5775_v42 }
 0x103   : > { %4966 = vmatprep.mubr.msk.f32.mxu1 %vm239_vm1, %v6080_v51  ;;  %5192 = vmatprep.mubr.msk.f32.mxu0 %vm239_vm1, %v5781_v44 }
 0x106   : > { %4967 = vmatmul.mubr.msk.f32.gmra.mrb[24].mxu1 %vm239_vm1, %v6091_v47  ;;  %5193 = vmatmul.mubr.msk.f32.gmra.mrb[8].mxu0 %vm239_vm1, %v5795_v46 }
 0x107   : > { %4969 = vmatprep.mubr.msk.f32.mxu1 %vm239_vm1, %v6094_v43  ;;  %5195 = vmatprep.mubr.msk.f32.mxu0 %vm239_vm1, %v5801_v48 }
 0x10a   : > { %4970 = vmatmul.mubr.msk.f32.gmra.mrb[26].mxu1 %vm239_vm1, %v6105_v39  ;;  %5196 = vmatmul.mubr.msk.f32.gmra.mrb[10].mxu0 %vm239_vm1, %v5815_v50 }
 0x10b   : > { %4972 = vmatprep.mubr.msk.f32.mxu1 %vm239_vm1, %v6108_v35  ;;  %5198 = vmatprep.mubr.msk.f32.mxu0 %vm239_vm1, %v5821_v52  ;;  %v6481_v52 = vld [vmem:[%s6595_s2] ss:$0 sm:$0xff] }
 0x10e   : > { %4973 = vmatmul.mubr.msk.f32.gmra.mrb[28].mxu1 %vm239_vm1, %v6119_v62  ;;  %5199 = vmatmul.mubr.msk.f32.gmra.mrb[12].mxu0 %vm239_vm1, %v5835_v54 }
 0x10f   : > { %4975 = vmatprep.mubr.msk.f32.mxu1 %vm239_vm1, %v6174_v24  ;;  %5201 = vmatprep.mubr.msk.f32.mxu0 %vm239_vm1, %v5839_v56 }
 0x112   : > { %4976 = vmatmul.mubr.msk.f32.gmra.mrb[30].mxu1 %vm239_vm1, %v6185_v25  ;;  %5202 = vmatmul.mubr.msk.f32.gmra.mrb[14].mxu0 %vm239_vm1, %v5850_v58 }
 0x113   : > { %5004 = vmatprep.mubr.msk.f32.mxu1 %vm239_vm1, %v5690_v26  ;;  %5204 = vmatprep.mubr.msk.f32.mxu0 %vm239_vm1, %v5856_v60  ;;  %v6702_v26 = vld [vmem:[#allocation27_spill] sm:$0xff] }
 0x116   : > { %5005 = vmatmul.mubr.msk.f32.vlgmr.msra.gmra.mrb[16].mxu1 %vm239_vm1, %v6674_v11  ;;  %5205 = vmatmul.mubr.msk.f32.gmra.mrb[16].mxu0 %vm239_vm1, %v5874_v63 }
 0x117   : > { %5007 = vmatprep.mubr.msk.f32.mxu1 %vm239_vm1, %v6676_v13  ;;  %5207 = vmatprep.mubr.msk.f32.mxu0 %vm239_vm1, %v5882_v2 }
 0x11a   : > { %5008 = vmatmul.mubr.msk.f32.gmra.mrb[18].mxu1 %vm239_vm1, %v6678_v15  ;;  %5208 = vmatmul.mubr.msk.f32.gmra.mrb[18].mxu0 %vm239_vm1, %v5898_v4 }
 0x11b   : > { %5010 = vmatprep.mubr.msk.f32.mxu1 %vm239_vm1, %v6680_v17  ;;  %5210 = vmatprep.mubr.msk.f32.mxu0 %vm239_vm1, %v5904_v6 }
 0x11e   : > { %5011 = vmatmul.mubr.msk.f32.gmra.mrb[20].mxu1 %vm239_vm1, %v6682_v19  ;;  %5211 = vmatmul.mubr.msk.f32.gmra.mrb[20].mxu0 %vm239_vm1, %v5918_v9 }
 0x11f   : > { %5013 = vmatprep.mubr.msk.f32.mxu1 %vm239_vm1, %v6684_v21  ;;  %5213 = vmatprep.mubr.msk.f32.mxu0 %vm239_vm1, %v5924_v55 }
 0x122   : > { %5014 = vmatmul.mubr.msk.f32.gmra.mrb[22].mxu1 %vm239_vm1, %v6686_v22  ;;  %5214 = vmatmul.mubr.msk.f32.gmra.mrb[22].mxu0 %vm239_vm1, %v5938_v53 }
 0x123   : > { %5016 = vmatprep.mubr.msk.f32.mxu1 %vm239_vm1, %v6688_v37  ;;  %5216 = vmatprep.mubr.msk.f32.mxu0 %vm239_vm1, %v5944_v49 }
 0x126   : > { %5017 = vmatmul.mubr.msk.f32.gmra.mrb[24].mxu1 %vm239_vm1, %v6690_v33  ;;  %5217 = vmatmul.mubr.msk.f32.gmra.mrb[24].mxu0 %vm239_vm1, %v5958_v45 }
 0x127   : > { %5019 = vmatprep.mubr.msk.f32.mxu1 %vm239_vm1, %v6692_v12  ;;  %5219 = vmatprep.mubr.msk.f32.mxu0 %vm239_vm1, %v5964_v41 }
 0x12a   : > { %5020 = vmatmul.mubr.msk.f32.gmra.mrb[26].mxu1 %vm239_vm1, %v6694_v16  ;;  %5220 = vmatmul.mubr.msk.f32.gmra.mrb[26].mxu0 %vm239_vm1, %v6702_v26 }
 0x12b   : > { %5022 = vmatprep.mubr.msk.f32.mxu1 %vm239_vm1, %v6696_v20  ;;  %5222 = vmatprep.mubr.msk.f32.mxu0 %vm239_vm1, %v6703_v27 }
 0x12e   : > { %5023 = vmatmul.mubr.msk.f32.gmra.mrb[28].mxu1 %vm239_vm1, %v6704_v30  ;;  %5223 = vmatmul.mubr.msk.f32.gmra.mrb[28].mxu0 %vm239_vm1, %v6705_v31 }
 0x12f   : > { %5025 = vmatprep.mubr.msk.f32.mxu1 %vm239_vm1, %v6312_v1  ;;  %5225 = vmatprep.mubr.msk.f32.mxu0 %vm239_vm1, %v4378_v29 }
 0x132   : > { %5026 = vmatmul.mubr.msk.f32.gmra.mrb[30].mxu1 %vm239_vm1, %v6323_v14  ;;  %5226 = vmatmul.mubr.msk.f32.gmra.mrb[30].mxu0 %vm239_vm1, %v4379_v32 }
 0x1a9   : > { %v4932_v34 = vpop.f32.mrb[0].mxu1 }
 0x1aa   : > { %v1479_v35 = vpop.f32.mrb[1].mxu1 }
 0x1ad   : > { %v4935_v36 = vpop.f32.mrb[2].mxu1 }
 0x1ae   : > { %v1489_v38 = vpop.f32.mrb[3].mxu1 }
 0x1b1   : > { %v4938_v39 = vpop.f32.mrb[4].mxu1 }
 0x1b2   : > { %v1499_v40 = vpop.f32.mrb[5].mxu1 }
 0x1b5   : > { %v4941_v41 = vpop.f32.mrb[6].mxu1 }
 0x1b6   : > { %v1509_v42 = vpop.f32.mrb[7].mxu1 }
 0x1b9   : > { %v4944_v43 = vpop.f32.mrb[8].mxu1 }
 0x1ba   : > { %v1519_v44 = vpop.f32.mrb[9].mxu1 }
 0x1bd   : > { %v6465_v45 = vpop.f32.mrb[10].mxu1 }
 0x1be   : > { %v6467_v46 = vpop.f32.mrb[11].mxu1 }
 0x1c1   : > { %v6469_v47 = vpop.f32.mrb[12].mxu1 }
 0x1c2   : > { %v6472_v48 = vpop.f32.mrb[13].mxu1 }
 0x1c5   : > { %v6474_v49 = vpop.f32.mrb[14].mxu1 }
 0x1c6   : > { %v6476_v50 = vpop.f32.mrb[15].mxu1 }
 0x1c9   : > { %v5182_v51 = vpop.f32.mrb[0].mxu0 }
 0x1ca   : > { %v5230_v53 = vadd.f32 %v5182_v51, %v4932_v34  ;;  %v3430_v54 = vpop.f32.mrb[1].mxu0 }
 0x1cb   : > { %v5231_v56 = vadd.f32 %v3430_v54, %v1479_v35 }
 0x1cc   : > { %v3629_v58 = vadd.f32 %v5230_v53, %v6481_v52 }
 0x1cd   : > { %v3628_v59 = vadd.f32 %v5231_v56, %v6481_v52  ;;  %v5185_v60 = vpop.f32.mrb[2].mxu0 }
 0x1ce   : > { %v3661_v62 = vmax.f32 %v3629_v58, 0.0  ;;  %v5232_v63 = vadd.f32 %v5185_v60, %v4935_v36  ;;  %v3440_v0 = vpop.f32.mrb[3].mxu0 }
 0x1cf   : > { %v3660_v2 = vmax.f32 %v3628_v59, 0.0  ;;  %v5233_v4 = vadd.f32 %v3440_v0, %v1489_v38 }
 0x1d0   : > { %v4450_v5 = vpack.c.bf16 %v3661_v62, %v3661_v62  ;;  %v3631_v6 = vadd.f32 %v5232_v63, %v6481_v52 }
 0x1d1   : > { %v4449_v7 = vpack.c.bf16 %v3660_v2, %v3660_v2  ;;  %v3630_v9 = vadd.f32 %v5233_v4, %v6481_v52  ;;  %v5188_v10 = vpop.f32.mrb[4].mxu0 }
 0x1d2   : > { %3822 = vst.msk [vmem:[%s6488_s17 + $0x4] sm:$0xf] %vm3820_vm2, %v4450_v5  ;;  %v3663_v55 = vmax.f32 %v3631_v6, 0.0  ;;  %v5234_v57 = vadd.f32 %v5188_v10, %v4938_v39  ;;  %v3450_v28 = vpop.f32.mrb[5].mxu0 }
 0x1d3   : > { %3821 = vst.msk [vmem:[%s6488_s17] sm:$0xf] %vm3820_vm2, %v4449_v7  ;;  %v3662_v24 = vmax.f32 %v3630_v9, 0.0  ;;  %v5235_v25 = vadd.f32 %v3450_v28, %v1499_v40 }
 0x1d4   : > { %v4452_v8 = vpack.c.bf16 %v3663_v55, %v3663_v55  ;;  %v3633_v11 = vadd.f32 %v5234_v57, %v6481_v52 }
 0x1d5   : > { %v4451_v13 = vpack.c.bf16 %v3662_v24, %v3662_v24  ;;  %v3632_v15 = vadd.f32 %v5235_v25, %v6481_v52  ;;  %v5191_v17 = vpop.f32.mrb[6].mxu0 }
 0x1d6   : > { %3824 = vst.msk [vmem:[%s6488_s17 + $0xc] sm:$0xf] %vm3820_vm2, %v4452_v8  ;;  %v3665_v19 = vmax.f32 %v3633_v11, 0.0  ;;  %v5236_v21 = vadd.f32 %v5191_v17, %v4941_v41  ;;  %v3460_v22 = vpop.f32.mrb[7].mxu0 }
 0x1d7   : > { %3823 = vst.msk [vmem:[%s6488_s17 + $0x8] sm:$0xf] %vm3820_vm2, %v4451_v13  ;;  %v3664_v37 = vmax.f32 %v3632_v15, 0.0  ;;  %v5237_v33 = vadd.f32 %v3460_v22, %v1509_v42 }
 0x1d8   : > { %v4454_v12 = vpack.c.bf16 %v3665_v19, %v3665_v19  ;;  %v3635_v16 = vadd.f32 %v5236_v21, %v6481_v52 }
 0x1d9   : > { %v4453_v20 = vpack.c.bf16 %v3664_v37, %v3664_v37  ;;  %v3634_v1 = vadd.f32 %v5237_v33, %v6481_v52  ;;  %v5194_v3 = vpop.f32.mrb[8].mxu0 }
 0x1da   : > { %3826 = vst.msk [vmem:[%s6488_s17 + $0x14] sm:$0xf] %vm3820_vm2, %v4454_v12  ;;  %v3667_v61 = vmax.f32 %v3635_v16, 0.0  ;;  %v5238_v14 = vadd.f32 %v5194_v3, %v4944_v43  ;;  %v3470_v18 = vpop.f32.mrb[9].mxu0 }
 0x1db   : > { %3825 = vst.msk [vmem:[%s6488_s17 + $0x10] sm:$0xf] %vm3820_vm2, %v4453_v20  ;;  %v3666_v23 = vmax.f32 %v3634_v1, 0.0  ;;  %v5239_v26 = vadd.f32 %v3470_v18, %v1519_v44 }
 0x1dc   : > { %v4456_v27 = vpack.c.bf16 %v3667_v61, %v3667_v61  ;;  %v3637_v29 = vadd.f32 %v5238_v14, %v6481_v52 }
 0x1dd   : > { %v4455_v30 = vpack.c.bf16 %v3666_v23, %v3666_v23  ;;  %v3636_v31 = vadd.f32 %v5239_v26, %v6481_v52  ;;  %v5197_v32 = vpop.f32.mrb[10].mxu0 }
 0x1de   : > { %3828 = vst.msk [vmem:[%s6488_s17 + $0x1c] sm:$0xf] %vm3820_vm2, %v4456_v27  ;;  %v3669_v34 = vmax.f32 %v3637_v29, 0.0  ;;  %v5240_v35 = vadd.f32 %v5197_v32, %v6465_v45  ;;  %v3480_v36 = vpop.f32.mrb[11].mxu0 }
 0x1df   : > { %3827 = vst.msk [vmem:[%s6488_s17 + $0x18] sm:$0xf] %vm3820_vm2, %v4455_v30  ;;  %v3668_v38 = vmax.f32 %v3636_v31, 0.0  ;;  %v5241_v39 = vadd.f32 %v3480_v36, %v6467_v46 }
 0x1e0   : > { %v4458_v40 = vpack.c.bf16 %v3669_v34, %v3669_v34  ;;  %v3639_v41 = vadd.f32 %v5240_v35, %v6481_v52 }
 0x1e1   : > { %v4457_v42 = vpack.c.bf16 %v3668_v38, %v3668_v38  ;;  %v3638_v43 = vadd.f32 %v5241_v39, %v6481_v52  ;;  %v5200_v44 = vpop.f32.mrb[12].mxu0 }
 0x1e2   : > { %3830 = vst.msk [vmem:[%s6488_s17 + $0x24] sm:$0xf] %vm3820_vm2, %v4458_v40  ;;  %v3671_v51 = vmax.f32 %v3639_v41, 0.0  ;;  %v5242_v45 = vadd.f32 %v5200_v44, %v6469_v47  ;;  %v3490_v53 = vpop.f32.mrb[13].mxu0 }
 0x1e3   : > { %3829 = vst.msk [vmem:[%s6488_s17 + $0x20] sm:$0xf] %vm3820_vm2, %v4457_v42  ;;  %v3670_v54 = vmax.f32 %v3638_v43, 0.0  ;;  %v5243_v46 = vadd.f32 %v3490_v53, %v6472_v48 }
 0x1e4   : > { %v4460_v56 = vpack.c.bf16 %v3671_v51, %v3671_v51  ;;  %v3641_v58 = vadd.f32 %v5242_v45, %v6481_v52 }
 0x1e5   : > { %v4459_v59 = vpack.c.bf16 %v3670_v54, %v3670_v54  ;;  %v3640_v60 = vadd.f32 %v5243_v46, %v6481_v52  ;;  %v5203_v62 = vpop.f32.mrb[14].mxu0 }
 0x1e6   : > { %3832 = vst.msk [vmem:[%s6488_s17 + $0x2c] sm:$0xf] %vm3820_vm2, %v4460_v56  ;;  %v3673_v63 = vmax.f32 %v3641_v58, 0.0  ;;  %v5244_v0 = vadd.f32 %v5203_v62, %v6474_v49  ;;  %v3500_v47 = vpop.f32.mrb[15].mxu0 }
 0x1e7   : > { %3831 = vst.msk [vmem:[%s6488_s17 + $0x28] sm:$0xf] %vm3820_vm2, %v4459_v59  ;;  %v3672_v2 = vmax.f32 %v3640_v60, 0.0  ;;  %v5245_v48 = vadd.f32 %v3500_v47, %v6476_v50 }
 0x1e8   : > { %v4462_v4 = vpack.c.bf16 %v3673_v63, %v3673_v63  ;;  %v3643_v5 = vadd.f32 %v5244_v0, %v6481_v52 }
 0x1e9   : > { %v4461_v6 = vpack.c.bf16 %v3672_v2, %v3672_v2  ;;  %v3642_v7 = vadd.f32 %v5245_v48, %v6481_v52  ;;  %v5006_v9 = vpop.f32.mrb[16].mxu1  ;;  %v5206_v10 = vpop.f32.mrb[16].mxu0 }
 0x1ea   : > { %3834 = vst.msk [vmem:[%s6488_s17 + $0x34] sm:$0xf] %vm3820_vm2, %v4462_v4  ;;  %v3675_v55 = vmax.f32 %v3643_v5, 0.0  ;;  %v5246_v49 = vadd.f32 %v5206_v10, %v5006_v9  ;;  %v1949_v57 = vpop.f32.mrb[17].mxu1  ;;  %v3510_v28 = vpop.f32.mrb[17].mxu0 }
 0x1eb   : > { %3833 = vst.msk [vmem:[%s6488_s17 + $0x30] sm:$0xf] %vm3820_vm2, %v4461_v6  ;;  %v3674_v24 = vmax.f32 %v3642_v7, 0.0  ;;  %v5247_v50 = vadd.f32 %v3510_v28, %v1949_v57 }
 0x1ec   : > { %v4464_v25 = vpack.c.bf16 %v3675_v55, %v3675_v55  ;;  %v3645_v8 = vadd.f32 %v5246_v49, %v6481_v52 }
 0x1ed   : > { %v4463_v11 = vpack.c.bf16 %v3674_v24, %v3674_v24  ;;  %v3644_v13 = vadd.f32 %v5247_v50, %v6481_v52  ;;  %v5009_v15 = vpop.f32.mrb[18].mxu1  ;;  %v5209_v17 = vpop.f32.mrb[18].mxu0 }
 0x1ee   : > { %3836 = vst.msk [vmem:[%s6488_s17 + $0x3c] sm:$0xf] %vm3820_vm2, %v4464_v25  ;;  %v3677_v19 = vmax.f32 %v3645_v8, 0.0  ;;  %v5248_v21 = vadd.f32 %v5209_v17, %v5009_v15  ;;  %v1959_v22 = vpop.f32.mrb[19].mxu1  ;;  %v3520_v37 = vpop.f32.mrb[19].mxu0 }
 0x1ef   : > { %3835 = vst.msk [vmem:[%s6488_s17 + $0x38] sm:$0xf] %vm3820_vm2, %v4463_v11  ;;  %v3676_v33 = vmax.f32 %v3644_v13, 0.0  ;;  %v5249_v12 = vadd.f32 %v3520_v37, %v1959_v22 }
 0x1f0   : > { %v4466_v16 = vpack.c.bf16 %v3677_v19, %v3677_v19  ;;  %v3647_v20 = vadd.f32 %v5248_v21, %v6481_v52 }
 0x1f1   : > { %v4465_v1 = vpack.c.bf16 %v3676_v33, %v3676_v33  ;;  %v3646_v3 = vadd.f32 %v5249_v12, %v6481_v52  ;;  %v5012_v61 = vpop.f32.mrb[20].mxu1  ;;  %v5212_v14 = vpop.f32.mrb[20].mxu0 }
 0x1f2   : > { %3838 = vst.msk [vmem:[%s6488_s17 + $0x44] sm:$0xf] %vm3820_vm2, %v4466_v16  ;;  %v3679_v18 = vmax.f32 %v3647_v20, 0.0  ;;  %v5250_v23 = vadd.f32 %v5212_v14, %v5012_v61  ;;  %v1969_v26 = vpop.f32.mrb[21].mxu1  ;;  %v3530_v27 = vpop.f32.mrb[21].mxu0 }
 0x1f3   : > { %3837 = vst.msk [vmem:[%s6488_s17 + $0x40] sm:$0xf] %vm3820_vm2, %v4465_v1  ;;  %v3678_v29 = vmax.f32 %v3646_v3, 0.0  ;;  %v5251_v30 = vadd.f32 %v3530_v27, %v1969_v26 }
 0x1f4   : > { %v4468_v31 = vpack.c.bf16 %v3679_v18, %v3679_v18  ;;  %v3649_v32 = vadd.f32 %v5250_v23, %v6481_v52 }
 0x1f5   : > { %v4467_v34 = vpack.c.bf16 %v3678_v29, %v3678_v29  ;;  %v3648_v35 = vadd.f32 %v5251_v30, %v6481_v52  ;;  %v5015_v36 = vpop.f32.mrb[22].mxu1  ;;  %v5215_v38 = vpop.f32.mrb[22].mxu0 }
 0x1f6   : > { %3840 = vst.msk [vmem:[%s6488_s17 + $0x4c] sm:$0xf] %vm3820_vm2, %v4468_v31  ;;  %v3681_v39 = vmax.f32 %v3649_v32, 0.0  ;;  %v5252_v40 = vadd.f32 %v5215_v38, %v5015_v36  ;;  %v1979_v41 = vpop.f32.mrb[23].mxu1  ;;  %v3540_v42 = vpop.f32.mrb[23].mxu0 }
 0x1f7   : > { %3839 = vst.msk [vmem:[%s6488_s17 + $0x48] sm:$0xf] %vm3820_vm2, %v4467_v34  ;;  %v3680_v43 = vmax.f32 %v3648_v35, 0.0  ;;  %v5253_v44 = vadd.f32 %v3540_v42, %v1979_v41 }
 0x1f8   : > { %v4470_v51 = vpack.c.bf16 %v3681_v39, %v3681_v39  ;;  %v3651_v45 = vadd.f32 %v5252_v40, %v6481_v52 }
 0x1f9   : > { %v4469_v53 = vpack.c.bf16 %v3680_v43, %v3680_v43  ;;  %v3650_v54 = vadd.f32 %v5253_v44, %v6481_v52  ;;  %v5018_v46 = vpop.f32.mrb[24].mxu1  ;;  %v5218_v56 = vpop.f32.mrb[24].mxu0 }
 0x1fa   : > { %3842 = vst.msk [vmem:[%s6488_s17 + $0x54] sm:$0xf] %vm3820_vm2, %v4470_v51  ;;  %v3683_v58 = vmax.f32 %v3651_v45, 0.0  ;;  %v5254_v59 = vadd.f32 %v5218_v56, %v5018_v46  ;;  %v1989_v60 = vpop.f32.mrb[25].mxu1  ;;  %v3550_v62 = vpop.f32.mrb[25].mxu0 }
 0x1fb   : > { %3841 = vst.msk [vmem:[%s6488_s17 + $0x50] sm:$0xf] %vm3820_vm2, %v4469_v53  ;;  %v3682_v63 = vmax.f32 %v3650_v54, 0.0  ;;  %v5255_v0 = vadd.f32 %v3550_v62, %v1989_v60 }
 0x1fc   : > { %v4472_v47 = vpack.c.bf16 %v3683_v58, %v3683_v58  ;;  %v3653_v2 = vadd.f32 %v5254_v59, %v6481_v52 }
 0x1fd   : > { %v4471_v48 = vpack.c.bf16 %v3682_v63, %v3682_v63  ;;  %v3652_v4 = vadd.f32 %v5255_v0, %v6481_v52  ;;  %v5021_v5 = vpop.f32.mrb[26].mxu1  ;;  %v5221_v6 = vpop.f32.mrb[26].mxu0 }
 0x1fe   : > { %3844 = vst.msk [vmem:[%s6488_s17 + $0x5c] sm:$0xf] %vm3820_vm2, %v4472_v47  ;;  %v3685_v7 = vmax.f32 %v3653_v2, 0.0  ;;  %v5256_v9 = vadd.f32 %v5221_v6, %v5021_v5  ;;  %v1999_v10 = vpop.f32.mrb[27].mxu1  ;;  %v3560_v55 = vpop.f32.mrb[27].mxu0 }
 0x1ff   : > { %3843 = vst.msk [vmem:[%s6488_s17 + $0x58] sm:$0xf] %vm3820_vm2, %v4471_v48  ;;  %v3684_v49 = vmax.f32 %v3652_v4, 0.0  ;;  %v5257_v57 = vadd.f32 %v3560_v55, %v1999_v10 }
 0x200   : > { %v4474_v28 = vpack.c.bf16 %v3685_v7, %v3685_v7  ;;  %v3655_v24 = vadd.f32 %v5256_v9, %v6481_v52 }
 0x201   : > { %v4473_v50 = vpack.c.bf16 %v3684_v49, %v3684_v49  ;;  %v3654_v25 = vadd.f32 %v5257_v57, %v6481_v52  ;;  %v5024_v8 = vpop.f32.mrb[28].mxu1  ;;  %v5224_v11 = vpop.f32.mrb[28].mxu0 }
 0x202   : > { %3846 = vst.msk [vmem:[%s6488_s17 + $0x64] sm:$0xf] %vm3820_vm2, %v4474_v28  ;;  %v3687_v13 = vmax.f32 %v3655_v24, 0.0  ;;  %v5258_v15 = vadd.f32 %v5224_v11, %v5024_v8  ;;  %v2009_v17 = vpop.f32.mrb[29].mxu1  ;;  %v3570_v19 = vpop.f32.mrb[29].mxu0 }
 0x203   : > { %3845 = vst.msk [vmem:[%s6488_s17 + $0x60] sm:$0xf] %vm3820_vm2, %v4473_v50  ;;  %v3686_v21 = vmax.f32 %v3654_v25, 0.0  ;;  %v5259_v22 = vadd.f32 %v3570_v19, %v2009_v17 }
 0x204   : > { %v4476_v37 = vpack.c.bf16 %v3687_v13, %v3687_v13  ;;  %v3657_v33 = vadd.f32 %v5258_v15, %v6481_v52 }
 0x205   : > { %v4475_v12 = vpack.c.bf16 %v3686_v21, %v3686_v21  ;;  %v3656_v16 = vadd.f32 %v5259_v22, %v6481_v52  ;;  %v5027_v20 = vpop.f32.mrb[30].mxu1  ;;  %v5227_v1 = vpop.f32.mrb[30].mxu0 }
 0x206   : > { %3848 = vst.msk [vmem:[%s6488_s17 + $0x6c] sm:$0xf] %vm3820_vm2, %v4476_v37  ;;  %v3689_v3 = vmax.f32 %v3657_v33, 0.0  ;;  %v5260_v61 = vadd.f32 %v5227_v1, %v5027_v20  ;;  %v2019_v14 = vpop.f32.mrb[31].mxu1  ;;  %v3580_v18 = vpop.f32.mrb[31].mxu0 }
 0x207   : > { %3847 = vst.msk [vmem:[%s6488_s17 + $0x68] sm:$0xf] %vm3820_vm2, %v4475_v12  ;;  %v3688_v23 = vmax.f32 %v3656_v16, 0.0  ;;  %v5261_v26 = vadd.f32 %v3580_v18, %v2019_v14 }
 0x208   : > { %v4478_v27 = vpack.c.bf16 %v3689_v3, %v3689_v3  ;;  %v3659_v29 = vadd.f32 %v5260_v61, %v6481_v52 }
 0x209   : > { %v4477_v30 = vpack.c.bf16 %v3688_v23, %v3688_v23  ;;  %v3658_v31 = vadd.f32 %v5261_v26, %v6481_v52 }
 0x20a   : > { %3850 = vst.msk [vmem:[%s6488_s17 + $0x74] sm:$0xf] %vm3820_vm2, %v4478_v27  ;;  %v3691_v32 = vmax.f32 %v3659_v29, 0.0 }
 0x20b   : > { %3849 = vst.msk [vmem:[%s6488_s17 + $0x70] sm:$0xf] %vm3820_vm2, %v4477_v30  ;;  %v3690_v34 = vmax.f32 %v3658_v31, 0.0 }
 0x20c   : > { %v4480_v35 = vpack.c.bf16 %v3691_v32, %v3691_v32 }
 0x20d   : > { %v4479_v36 = vpack.c.bf16 %v3690_v34, %v3690_v34 }
 0x20e   : > { %3852 = vst.msk [vmem:[%s6488_s17 + $0x7c] sm:$0xf] %vm3820_vm2, %v4480_v35 }
 0x20f   : > { %3851 = vst.msk [vmem:[%s6488_s17 + $0x78] sm:$0xf] %vm3820_vm2, %v4479_v36 }
 0x210 PF: > { %s13_s12 = sadd.s32 1, %s5501_s12  }
 0x211   : > { %p10_p5 = scmp.ge.s32.totalorder %s13_s12, 4  }
 0x213   :  { %12 = sbr.rel (!%p10_p5) target bundleno = 1 (0x1), region = 72 }

</bundles_post_ra>
